<compile_context>
chip_gen: v6e
topology: v6e:2x2x1
jax: 0.10.0
libtpu: 0.0.40
codegen_flags: <defaults>
</compile_context>

<pallas_src>
import functools

import jax
import jax.numpy as jnp
from jax.experimental import pallas as pl
from jax.experimental.pallas import tpu as pltpu

# ---------------- config (small synthetic t5-encoder) ----------------
VOCAB = 100
D_MODEL = 32
N_HEADS = 4
D_KV = 8            # head dim
D_FF = 64
N_LAYERS = 2
REL_BUCKETS = 8
REL_MAX_DIST = 16
LN_EPS = 1e-6

LANE = 128


def _round_up(x, m):
    return ((x + m - 1) // m) * m


D_PAD = _round_up(D_MODEL, LANE)          # 128
INNER = N_HEADS * D_KV                    # 32
KV_PAD = _round_up(INNER, LANE)           # 128  (q/k/v each padded to 128 lanes)
FF_PAD = _round_up(D_FF, LANE)            # 128
H_PAD = KV_PAD // D_KV                    # padded head count (ghost heads are zero)
assert KV_PAD % D_KV == 0


# ---------------- per-layer fused kernel (one grid step = one layer) ----------------
def _t5_layer_kernel(hidden_ref, mask_ref, relb_ref,
                     ln1_ref, wqkv_ref, wo_ref, ln2_ref, wi_ref, wff_ref,
                     lnf_ref, out_ref, h_ref, *, d_model, d_kv, eps):
    l = pl.program_id(1)
    n_layers = pl.num_programs(1)

    bt, S, d_pad = hidden_ref.shape       # batch tile (=1 here), seq, padded model dim
    kv_pad = wo_ref.shape[1]
    hp = kv_pad // d_kv                   # padded head count
    N = bt * S

    # ---- init running hidden state (first layer of this batch tile) ----
    @pl.when(l == 0)
    def _init():
        h_ref[...] = hidden_ref[...].reshape(N, d_pad)

    m = mask_ref[...].reshape(bt, S)                       # [bt, S] f32
    neg = (1.0 - m) * (-1e9)                               # additive mask bias

    def rmsnorm(x, w):
        # T5 LayerNorm: no mean subtraction, no bias.  Padded lanes of x are
        # zero, so divide by the *real* d_model, not the padded width.
        var = jnp.sum(x * x, axis=-1, keepdims=True) * (1.0 / d_model)
        return x * jax.lax.rsqrt(var + eps) * w

    h = h_ref[...]                                         # [N, d_pad] f32

    # ------------------- self-attention block -------------------
    normed = rmsnorm(h, ln1_ref[0])
    # One lane-dense fused QKV matmul (bf16 in, f32 accumulate).
    qkv = jnp.dot(normed.astype(jnp.bfloat16), wqkv_ref[0],
                  preferred_element_type=jnp.float32)      # [N, 3*kv_pad]

    def heads(x):                                          # [N, kv_pad] -> [bt*hp, S, d_kv]
        x = x.reshape(bt, S, hp, d_kv).transpose(0, 2, 1, 3)
        return x.reshape(bt * hp, S, d_kv).astype(jnp.bfloat16)

    q = heads(qkv[:, :kv_pad])                             # 128-aligned lane slices
    k = heads(qkv[:, kv_pad:2 * kv_pad])
    v = heads(qkv[:, 2 * kv_pad:])

    # T5 attention has NO 1/sqrt(d) scaling.  All heads in one batched einsum.
    s = jnp.einsum('bqd,bkd->bqk', q, k,
                   preferred_element_type=jnp.float32)     # [bt*hp, S, S]
    s = (s.reshape(bt, hp, S, S)
         + relb_ref[...][None]                             # [hp, S, S] (ghost heads = 0)
         + neg[:, None, None, :])
    s = s - jnp.max(s, axis=-1, keepdims=True)             # keep max trick (safety)
    p = jnp.exp(s)
    p = p / jnp.sum(p, axis=-1, keepdims=True)             # exact division (parity)
    p = p.reshape(bt * hp, S, S).astype(jnp.bfloat16)

    ctx = jnp.einsum('bqk,bkd->bqd', p, v,
                     preferred_element_type=jnp.float32)   # [bt*hp, S, d_kv]
    ctx = (ctx.reshape(bt, hp, S, d_kv)
           .transpose(0, 2, 1, 3)
           .reshape(N, kv_pad))                            # ghost-head lanes are zero
    h = h + jnp.dot(ctx.astype(jnp.bfloat16), wo_ref[0],
                    preferred_element_type=jnp.float32)

    # ------------------- feed-forward (DenseReluDense) -------------------
    normed2 = rmsnorm(h, ln2_ref[0])
    ff = jnp.maximum(
        jnp.dot(normed2.astype(jnp.bfloat16), wi_ref[0],
                preferred_element_type=jnp.float32), 0.0)
    h = h + jnp.dot(ff.astype(jnp.bfloat16), wff_ref[0],
                    preferred_element_type=jnp.float32)

    h_ref[...] = h

    # ---- final RMSNorm fused with masked average pool (last layer only) ----
    @pl.when(l == n_layers - 1)
    def _finalize():
        hf = rmsnorm(h, lnf_ref[...])                      # [N, d_pad]
        h3 = hf.reshape(bt, S, d_pad)
        pooled = jnp.sum(h3 * m[:, :, None], axis=1)       # [bt, d_pad]
        cnt = jnp.maximum(jnp.sum(m, axis=1, keepdims=True), 1.0)
        out_ref[...] = (pooled / cnt).reshape(bt, 1, d_pad)   # 128-lane-dense store


# ---------------- glue (plain JAX): embeddings, relative position bias ----------------
def _relative_position_bucket(relative_position, num_buckets, max_distance):
    # bidirectional=True (encoder)
    num_buckets //= 2
    relative_buckets = (relative_position > 0).astype(jnp.int32) * num_buckets
    relative_position = jnp.abs(relative_position)
    max_exact = num_buckets // 2
    is_small = relative_position < max_exact
    rp = jnp.maximum(relative_position, 1).astype(jnp.float32)
    rel_if_large = max_exact + (
        jnp.log(rp / max_exact) / jnp.log(max_distance / max_exact)
        * (num_buckets - max_exact)
    ).astype(jnp.int32)
    rel_if_large = jnp.minimum(rel_if_large, num_buckets - 1)
    relative_buckets += jnp.where(is_small, relative_position, rel_if_large)
    return relative_buckets


def compute_position_bias(rel_bias_table, S):
    q_pos = jnp.arange(S)[:, None]
    k_pos = jnp.arange(S)[None, :]
    buckets = _relative_position_bucket(k_pos - q_pos, REL_BUCKETS, REL_MAX_DIST)
    values = rel_bias_table[buckets]          # [S, S, H]
    return jnp.transpose(values, (2, 0, 1))   # [H, S, S]


def init_params(key):
    def nrm(k, shape, scale=0.05):
        return scale * jax.random.normal(k, shape, dtype=jnp.float32)

    keys = jax.random.split(key, 2 + N_LAYERS)
    params = {
        "embed": nrm(keys[0], (VOCAB, D_MODEL), 1.0),
        "rel_bias": nrm(keys[1], (REL_BUCKETS, N_HEADS), 0.1),
        "final_ln": jnp.ones((D_MODEL,), jnp.float32),
        "layers": [],
    }
    for l in range(N_LAYERS):
        lk = jax.random.split(keys[2 + l], 6)
        params["layers"].append({
            "ln1": jnp.ones((D_MODEL,), jnp.float32),
            "wq": nrm(lk[0], (D_MODEL, INNER)),
            "wk": nrm(lk[1], (D_MODEL, INNER)),
            "wv": nrm(lk[2], (D_MODEL, INNER)),
            "wo": nrm(lk[3], (INNER, D_MODEL)),
            "ln2": jnp.ones((D_MODEL,), jnp.float32),
            "wi": nrm(lk[4], (D_MODEL, D_FF)),
            "wo_ff": nrm(lk[5], (D_FF, D_MODEL)),
        })
    return params


def _pad2(w, rows, cols):
    out = jnp.zeros((rows, cols), w.dtype)
    return out.at[:w.shape[0], :w.shape[1]].set(w)


def t5_link_pred_forward(params, input_ids, attention_mask):
    B, S = input_ids.shape

    # Embedding gather + relative-position bucket table stay in plain JAX
    # (data-dependent gathers); everything else runs in the Pallas kernel.
    hidden0 = params["embed"][input_ids].astype(jnp.float32)          # [B, S, D]
    hidden0 = jnp.zeros((B, S, D_PAD), jnp.float32).at[:, :, :D_MODEL].set(hidden0)
    mask3 = attention_mask.astype(jnp.float32)[:, None, :]            # [B, 1, S]

    relb = compute_position_bias(params["rel_bias"], S)               # [H, S, S]
    relb = jnp.zeros((H_PAD, S, S), jnp.float32).at[:N_HEADS].set(relb)

    layers = params["layers"]
    # Fused, lane-padded QKV weight: [L, D_PAD, 3*KV_PAD] (128-aligned q/k/v splits).
    wqkv = jnp.stack([jnp.concatenate([_pad2(lp["wq"], D_PAD, KV_PAD),
                                       _pad2(lp["wk"], D_PAD, KV_PAD),
                                       _pad2(lp["wv"], D_PAD, KV_PAD)], axis=1)
                      for lp in layers]).astype(jnp.bfloat16)          # [L, D_PAD, 384]
    wo = jnp.stack([_pad2(lp["wo"], KV_PAD, D_PAD)
                    for lp in layers]).astype(jnp.bfloat16)            # [L, KV_PAD, D_PAD]
    wi = jnp.stack([_pad2(lp["wi"], D_PAD, FF_PAD)
                    for lp in layers]).astype(jnp.bfloat16)            # [L, D_PAD, FF_PAD]
    wff = jnp.stack([_pad2(lp["wo_ff"], FF_PAD, D_PAD)
                     for lp in layers]).astype(jnp.bfloat16)           # [L, FF_PAD, D_PAD]
    ln1 = jnp.stack([_pad2(lp["ln1"][None, :], 1, D_PAD) for lp in layers])  # [L,1,D_PAD]
    ln2 = jnp.stack([_pad2(lp["ln2"][None, :], 1, D_PAD) for lp in layers])  # [L,1,D_PAD]
    lnf = _pad2(params["final_ln"][None, :], 1, D_PAD)                        # [1, D_PAD]

    # Grid: leading parallel axis over batch (one example per tile -> both TCs
    # on v7x), inner "arbitrary" axis over layers with streamed weights.
    grid = (B, N_LAYERS)

    per_layer_bytes = sum(int(a.size // N_LAYERS) * a.dtype.itemsize
                          for a in (wqkv, wo, wi, wff, ln1, ln2))
    resident_bytes = sum(int(a.size) * a.dtype.itemsize
                         for a in (relb, lnf, mask3)) + S * D_PAD * 4 * 3
    # Double-buffered per-layer weights + constants/activations + headroom.
    vmem_limit = int(min(48 << 20, 3 * per_layer_bytes + resident_bytes + (8 << 20)))

    in_specs = [
        pl.BlockSpec((1, S, D_PAD), lambda b, l: (b, 0, 0)),            # hidden0 tile
        pl.BlockSpec((1, 1, S), lambda b, l: (b, 0, 0)),                # mask tile
        pl.BlockSpec((H_PAD, S, S), lambda b, l: (0, 0, 0)),            # rel-pos bias
        pl.BlockSpec((1, 1, D_PAD), lambda b, l: (l, 0, 0)),            # ln1[l]
        pl.BlockSpec((1, D_PAD, 3 * KV_PAD), lambda b, l: (l, 0, 0)),   # wqkv[l]
        pl.BlockSpec((1, KV_PAD, D_PAD), lambda b, l: (l, 0, 0)),       # wo[l]
        pl.BlockSpec((1, 1, D_PAD), lambda b, l: (l, 0, 0)),            # ln2[l]
        pl.BlockSpec((1, D_PAD, FF_PAD), lambda b, l: (l, 0, 0)),       # wi[l]
        pl.BlockSpec((1, FF_PAD, D_PAD), lambda b, l: (l, 0, 0)),       # wff[l]
        pl.BlockSpec((1, D_PAD), lambda b, l: (0, 0)),                  # final ln
    ]
    out_specs = pl.BlockSpec((1, 1, D_PAD), lambda b, l: (b, 0, 0))

    kernel = functools.partial(_t5_layer_kernel, d_model=D_MODEL,
                               d_kv=D_KV, eps=LN_EPS)

    # TODO(synk): at real sentence-t5-base sizes, tile attention over q/k
    # blocks with online softmax, deepen the weight pipeline on v5e
    # (pipeline_mode=pl.Buffered(3)), and consider fp8 weights on v7x.
    out = pl.pallas_call(
        kernel,
        out_shape=jax.ShapeDtypeStruct((B, 1, D_PAD), jnp.float32),
        grid=grid,
        in_specs=in_specs,
        out_specs=out_specs,
        scratch_shapes=[pltpu.VMEM((S, D_PAD), jnp.float32)],   # running hidden state
        compiler_params=pltpu.CompilerParams(
            dimension_semantics=("parallel", "arbitrary"),
            vmem_limit_bytes=vmem_limit),
    )(hidden0, mask3, relb, ln1, wqkv, wo, ln2, wi, wff, lnf)

    return out[:, 0, :D_MODEL]


if __name__ == "__main__":
    key = jax.random.PRNGKey(0)
    pkey, ikey = jax.random.split(key)
    params = init_params(pkey)

    B, S = 2, 8
    input_ids = jax.random.randint(ikey, (B, S), 0, VOCAB, dtype=jnp.int32)
    attention_mask = jnp.array([[1, 1, 1, 1, 1, 1, 1, 1],
                                [1, 1, 1, 1, 1, 0, 0, 0]], dtype=jnp.int32)

    out = jax.jit(t5_link_pred_forward)(params, input_ids, attention_mask)
    out = jax.block_until_ready(out)
    assert out.shape == (B, D_MODEL) and bool(jnp.all(jnp.isfinite(out)))
    # TODO(synk): pretrained sentence-t5-base weights / tokenizer are not
    # loadable here; weights are synthetic but forward semantics match.
    print("KERNEL_OK")
</pallas_src>

<mosaic_0001>
module attributes {stable_mosaic.version = 11 : i64} {
  func.func @_t5_layer_kernel(%arg0: i32, %arg1: i32, %arg2: memref<1x8x128xf32, #tpu.memory_space<vmem>>, %arg3: memref<1x1x8xf32, #tpu.memory_space<vmem>>, %arg4: memref<16x8x8xf32, #tpu.memory_space<vmem>>, %arg5: memref<1x1x128xf32, #tpu.memory_space<vmem>>, %arg6: memref<1x128x384xbf16, #tpu.memory_space<vmem>>, %arg7: memref<1x128x128xbf16, #tpu.memory_space<vmem>>, %arg8: memref<1x1x128xf32, #tpu.memory_space<vmem>>, %arg9: memref<1x128x128xbf16, #tpu.memory_space<vmem>>, %arg10: memref<1x128x128xbf16, #tpu.memory_space<vmem>>, %arg11: memref<1x128xf32, #tpu.memory_space<vmem>>, %arg12: memref<1x1x128xf32, #tpu.memory_space<vmem>>, %arg13: memref<8x128xf32, #tpu.memory_space<vmem>>) attributes {dimension_semantics = [#tpu.dimension_semantics<parallel>, #tpu.dimension_semantics<arbitrary>], iteration_bounds = array<i64: 2, 2>, scalar_prefetch = 0 : i64, scratch_operands = 1 : i64, tpu.core_type = #tpu.core_type<tc>, window_params = [{transform_indices = @transform_0, window_bounds = array<i64: 1, 8, 128>}, {transform_indices = @transform_1, window_bounds = array<i64: 1, 1, 8>}, {pipeline_mode = #tpu.pipeline_mode<synchronous>, transform_indices = @transform_2, window_bounds = array<i64: 16, 8, 8>}, {transform_indices = @transform_3, window_bounds = array<i64: 1, 1, 128>}, {transform_indices = @transform_4, window_bounds = array<i64: 1, 128, 384>}, {transform_indices = @transform_5, window_bounds = array<i64: 1, 128, 128>}, {transform_indices = @transform_6, window_bounds = array<i64: 1, 1, 128>}, {transform_indices = @transform_7, window_bounds = array<i64: 1, 128, 128>}, {transform_indices = @transform_8, window_bounds = array<i64: 1, 128, 128>}, {pipeline_mode = #tpu.pipeline_mode<synchronous>, transform_indices = @transform_9, window_bounds = array<i64: 1, 128>}, {transform_indices = @transform_10, window_bounds = array<i64: 1, 1, 128>}]} {
    %c0_i32 = arith.constant 0 : i32
    %0 = arith.cmpi eq, %arg1, %c0_i32 : i32
    %1 = arith.extui %0 : i1 to i32
    %c0_i32_0 = arith.constant 0 : i32
    %2 = arith.cmpi ne, %1, %c0_i32_0 : i32
    scf.if %2 {
      %c0_45 = arith.constant 0 : index
      %c0_46 = arith.constant 0 : index
      %c0_47 = arith.constant 0 : index
      %100 = vector.load %arg2[%c0_45, %c0_46, %c0_47] : memref<1x8x128xf32, #tpu.memory_space<vmem>>, vector<1x8x128xf32>
      %101 = vector.shape_cast %100 : vector<1x8x128xf32> to vector<8x128xf32>
      %c0_48 = arith.constant 0 : index
      %c0_49 = arith.constant 0 : index
      %102 = vector.load %arg13[%c0_48, %c0_49] : memref<8x128xf32, #tpu.memory_space<vmem>>, vector<8x128xf32>
      tpu.vector_store %arg13[%c0_48, %c0_49], %101 {strides = array<i32>} : memref<8x128xf32, #tpu.memory_space<vmem>>, vector<8x128xf32>,
    } else {
    }
    %c0 = arith.constant 0 : index
    %c0_1 = arith.constant 0 : index
    %c0_2 = arith.constant 0 : index
    %3 = vector.load %arg3[%c0, %c0_1, %c0_2] : memref<1x1x8xf32, #tpu.memory_space<vmem>>, vector<1x1x8xf32>
    %4 = vector.shape_cast %3 : vector<1x1x8xf32> to vector<1x8xf32>
    %cst = arith.constant 1.000000e+00 : f32
    %5 = vector.broadcast %cst : f32 to vector<1x8xf32>
    %6 = arith.subf %5, %4 : vector<1x8xf32>
    %cst_3 = arith.constant -1.000000e+09 : f32
    %7 = vector.broadcast %cst_3 : f32 to vector<1x8xf32>
    %8 = arith.mulf %6, %7 : vector<1x8xf32>
    %c0_4 = arith.constant 0 : index
    %c0_5 = arith.constant 0 : index
    %9 = vector.load %arg13[%c0_4, %c0_5] : memref<8x128xf32, #tpu.memory_space<vmem>>, vector<8x128xf32>
    %c0_6 = arith.constant 0 : index
    %c0_7 = arith.constant 0 : index
    %c0_8 = arith.constant 0 : index
    %10 = vector.load %arg5[%c0_6, %c0_7, %c0_8] : memref<1x1x128xf32, #tpu.memory_space<vmem>>, vector<1x1x128xf32>
    %11 = vector.shape_cast %10 : vector<1x1x128xf32> to vector<1x128xf32>
    %12 = arith.mulf %9, %9 : vector<8x128xf32>
    %cst_9 = arith.constant dense<0.000000e+00> : vector<8xf32>
    %13 = vector.multi_reduction <add>, %12, %cst_9 [1] : vector<8x128xf32> to vector<8xf32>
    %14 = vector.shape_cast %13 : vector<8xf32> to vector<8x1xf32>
    %cst_10 = arith.constant 3.125000e-02 : f32
    %15 = vector.broadcast %cst_10 : f32 to vector<8x1xf32>
    %16 = arith.mulf %14, %15 : vector<8x1xf32>
    %cst_11 = arith.constant 9.99999997E-7 : f32
    %17 = vector.broadcast %cst_11 : f32 to vector<8x1xf32>
    %18 = arith.addf %16, %17 : vector<8x1xf32>
    %19 = math.rsqrt %18 : vector<8x1xf32>
    %20 = vector.broadcast %19 : vector<8x1xf32> to vector<8x128xf32>
    %21 = arith.mulf %9, %20 : vector<8x128xf32>
    %22 = vector.broadcast %11 : vector<1x128xf32> to vector<8x128xf32>
    %23 = arith.mulf %21, %22 : vector<8x128xf32>
    %24 = arith.truncf %23 : vector<8x128xf32> to vector<8x128xbf16>
    %c0_12 = arith.constant 0 : index
    %c0_13 = arith.constant 0 : index
    %c0_14 = arith.constant 0 : index
    %25 = vector.load %arg6[%c0_12, %c0_13, %c0_14] : memref<1x128x384xbf16, #tpu.memory_space<vmem>>, vector<1x128x384xbf16>
    %26 = vector.shape_cast %25 : vector<1x128x384xbf16> to vector<128x384xbf16>
    %cst_15 = arith.constant dense<0.000000e+00> : vector<8x384xf32>
    %27 = tpu.matmul %24, %26, %cst_15 {dimension_numbers = #tpu.dot_dimension_numbers<[1], [0], [0], [1], [0, 0, 1, 1], [], []>} : vector<8x128xbf16>, vector<128x384xbf16>, vector<8x384xf32> -> vector<8x384xf32>
    %28 = vector.extract_strided_slice %27 {offsets = [0, 0], sizes = [8, 128], strides = [1, 1]} : vector<8x384xf32> to vector<8x128xf32>
    %29 = vector.shape_cast %28 : vector<8x128xf32> to vector<1x8x16x8xf32>
    %30 = tpu.transpose %29, [0, 2, 1, 3] : vector<1x8x16x8xf32> -> vector<1x16x8x8xf32>
    %31 = vector.shape_cast %30 : vector<1x16x8x8xf32> to vector<16x8x8xf32>
    %32 = arith.truncf %31 : vector<16x8x8xf32> to vector<16x8x8xbf16>
    %33 = vector.extract_strided_slice %27 {offsets = [0, 128], sizes = [8, 128], strides = [1, 1]} : vector<8x384xf32> to vector<8x128xf32>
    %34 = vector.shape_cast %33 : vector<8x128xf32> to vector<1x8x16x8xf32>
    %35 = tpu.transpose %34, [0, 2, 1, 3] : vector<1x8x16x8xf32> -> vector<1x16x8x8xf32>
    %36 = vector.shape_cast %35 : vector<1x16x8x8xf32> to vector<16x8x8xf32>
    %37 = arith.truncf %36 : vector<16x8x8xf32> to vector<16x8x8xbf16>
    %38 = vector.extract_strided_slice %27 {offsets = [0, 256], sizes = [8, 128], strides = [1, 1]} : vector<8x384xf32> to vector<8x128xf32>
    %39 = vector.shape_cast %38 : vector<8x128xf32> to vector<1x8x16x8xf32>
    %40 = tpu.transpose %39, [0, 2, 1, 3] : vector<1x8x16x8xf32> -> vector<1x16x8x8xf32>
    %41 = vector.shape_cast %40 : vector<1x16x8x8xf32> to vector<16x8x8xf32>
    %42 = arith.truncf %41 : vector<16x8x8xf32> to vector<16x8x8xbf16>
    "tpu.trace_start"() <{level = 10 : i32, message = "bqd,bkd->bqk"}> : () -> ()
    %cst_16 = arith.constant dense<0.000000e+00> : vector<16x8x8xf32>
    %43 = tpu.matmul %32, %37, %cst_16 {dimension_numbers = #tpu.dot_dimension_numbers<[2], [2], [1], [1], [0, 0, 0, 1, 1, 1], [0], [0]>} : vector<16x8x8xbf16>, vector<16x8x8xbf16>, vector<16x8x8xf32> -> vector<16x8x8xf32>
    "tpu.trace_stop"() : () -> ()
    %44 = vector.shape_cast %43 : vector<16x8x8xf32> to vector<1x16x8x8xf32>
    %c0_17 = arith.constant 0 : index
    %c0_18 = arith.constant 0 : index
    %c0_19 = arith.constant 0 : index
    %45 = vector.load %arg4[%c0_17, %c0_18, %c0_19] : memref<16x8x8xf32, #tpu.memory_space<vmem>>, vector<16x8x8xf32>
    %46 = vector.shape_cast %45 : vector<16x8x8xf32> to vector<1x16x8x8xf32>
    %47 = arith.addf %44, %46 : vector<1x16x8x8xf32>
    %48 = vector.shape_cast %8 : vector<1x8xf32> to vector<1x1x1x8xf32>
    %49 = vector.broadcast %48 : vector<1x1x1x8xf32> to vector<1x16x8x8xf32>
    %50 = arith.addf %47, %49 : vector<1x16x8x8xf32>
    %cst_20 = arith.constant dense<0xFF800000> : vector<1x16x8xf32>
    %51 = vector.multi_reduction <maximumf>, %50, %cst_20 [3] : vector<1x16x8x8xf32> to vector<1x16x8xf32>
    %52 = vector.shape_cast %51 : vector<1x16x8xf32> to vector<1x16x8x1xf32>
    %53 = vector.broadcast %52 : vector<1x16x8x1xf32> to vector<1x16x8x8xf32>
    %54 = arith.subf %50, %53 : vector<1x16x8x8xf32>
    %55 = math.exp %54 : vector<1x16x8x8xf32>
    %cst_21 = arith.constant dense<0.000000e+00> : vector<1x16x8xf32>
    %56 = vector.multi_reduction <add>, %55, %cst_21 [3] : vector<1x16x8x8xf32> to vector<1x16x8xf32>
    %57 = vector.shape_cast %56 : vector<1x16x8xf32> to vector<1x16x8x1xf32>
    %58 = vector.broadcast %57 : vector<1x16x8x1xf32> to vector<1x16x8x8xf32>
    %59 = arith.divf %55, %58 : vector<1x16x8x8xf32>
    %60 = vector.shape_cast %59 : vector<1x16x8x8xf32> to vector<16x8x8xf32>
    %61 = arith.truncf %60 : vector<16x8x8xf32> to vector<16x8x8xbf16>
    "tpu.trace_start"() <{level = 10 : i32, message = "bqk,bkd->bqd"}> : () -> ()
    %cst_22 = arith.constant dense<0.000000e+00> : vector<16x8x8xf32>
    %62 = tpu.matmul %61, %42, %cst_22 {dimension_numbers = #tpu.dot_dimension_numbers<[2], [1], [1], [2], [0, 0, 0, 1, 1, 2], [0], [0]>} : vector<16x8x8xbf16>, vector<16x8x8xbf16>, vector<16x8x8xf32> -> vector<16x8x8xf32>
    "tpu.trace_stop"() : () -> ()
    %63 = vector.shape_cast %62 : vector<16x8x8xf32> to vector<1x16x8x8xf32>
    %64 = tpu.transpose %63, [0, 2, 1, 3] : vector<1x16x8x8xf32> -> vector<1x8x16x8xf32>
    %65 = vector.shape_cast %64 : vector<1x8x16x8xf32> to vector<8x128xf32>
    %66 = arith.truncf %65 : vector<8x128xf32> to vector<8x128xbf16>
    %c0_23 = arith.constant 0 : index
    %c0_24 = arith.constant 0 : index
    %c0_25 = arith.constant 0 : index
    %67 = vector.load %arg7[%c0_23, %c0_24, %c0_25] : memref<1x128x128xbf16, #tpu.memory_space<vmem>>, vector<1x128x128xbf16>
    %68 = vector.shape_cast %67 : vector<1x128x128xbf16> to vector<128x128xbf16>
    %cst_26 = arith.constant dense<0.000000e+00> : vector<8x128xf32>
    %69 = tpu.matmul %66, %68, %cst_26 {dimension_numbers = #tpu.dot_dimension_numbers<[1], [0], [0], [1], [0, 0, 1, 1], [], []>} : vector<8x128xbf16>, vector<128x128xbf16>, vector<8x128xf32> -> vector<8x128xf32>
    %70 = arith.addf %9, %69 : vector<8x128xf32>
    %c0_27 = arith.constant 0 : index
    %c0_28 = arith.constant 0 : index
    %c0_29 = arith.constant 0 : index
    %71 = vector.load %arg8[%c0_27, %c0_28, %c0_29] : memref<1x1x128xf32, #tpu.memory_space<vmem>>, vector<1x1x128xf32>
    %72 = vector.shape_cast %71 : vector<1x1x128xf32> to vector<1x128xf32>
    %73 = arith.mulf %70, %70 : vector<8x128xf32>
    %cst_30 = arith.constant dense<0.000000e+00> : vector<8xf32>
    %74 = vector.multi_reduction <add>, %73, %cst_30 [1] : vector<8x128xf32> to vector<8xf32>
    %75 = vector.shape_cast %74 : vector<8xf32> to vector<8x1xf32>
    %cst_31 = arith.constant 3.125000e-02 : f32
    %76 = vector.broadcast %cst_31 : f32 to vector<8x1xf32>
    %77 = arith.mulf %75, %76 : vector<8x1xf32>
    %cst_32 = arith.constant 9.99999997E-7 : f32
    %78 = vector.broadcast %cst_32 : f32 to vector<8x1xf32>
    %79 = arith.addf %77, %78 : vector<8x1xf32>
    %80 = math.rsqrt %79 : vector<8x1xf32>
    %81 = vector.broadcast %80 : vector<8x1xf32> to vector<8x128xf32>
    %82 = arith.mulf %70, %81 : vector<8x128xf32>
    %83 = vector.broadcast %72 : vector<1x128xf32> to vector<8x128xf32>
    %84 = arith.mulf %82, %83 : vector<8x128xf32>
    %85 = arith.truncf %84 : vector<8x128xf32> to vector<8x128xbf16>
    %c0_33 = arith.constant 0 : index
    %c0_34 = arith.constant 0 : index
    %c0_35 = arith.constant 0 : index
    %86 = vector.load %arg9[%c0_33, %c0_34, %c0_35] : memref<1x128x128xbf16, #tpu.memory_space<vmem>>, vector<1x128x128xbf16>
    %87 = vector.shape_cast %86 : vector<1x128x128xbf16> to vector<128x128xbf16>
    %cst_36 = arith.constant dense<0.000000e+00> : vector<8x128xf32>
    %88 = tpu.matmul %85, %87, %cst_36 {dimension_numbers = #tpu.dot_dimension_numbers<[1], [0], [0], [1], [0, 0, 1, 1], [], []>} : vector<8x128xbf16>, vector<128x128xbf16>, vector<8x128xf32> -> vector<8x128xf32>
    %cst_37 = arith.constant 0.000000e+00 : f32
    %89 = vector.broadcast %cst_37 : f32 to vector<8x128xf32>
    %90 = arith.maximumf %88, %89 : vector<8x128xf32>
    %91 = arith.truncf %90 : vector<8x128xf32> to vector<8x128xbf16>
    %c0_38 = arith.constant 0 : index
    %c0_39 = arith.constant 0 : index
    %c0_40 = arith.constant 0 : index
    %92 = vector.load %arg10[%c0_38, %c0_39, %c0_40] : memref<1x128x128xbf16, #tpu.memory_space<vmem>>, vector<1x128x128xbf16>
    %93 = vector.shape_cast %92 : vector<1x128x128xbf16> to vector<128x128xbf16>
    %cst_41 = arith.constant dense<0.000000e+00> : vector<8x128xf32>
    %94 = tpu.matmul %91, %93, %cst_41 {dimension_numbers = #tpu.dot_dimension_numbers<[1], [0], [0], [1], [0, 0, 1, 1], [], []>} : vector<8x128xbf16>, vector<128x128xbf16>, vector<8x128xf32> -> vector<8x128xf32>
    %95 = arith.addf %70, %94 : vector<8x128xf32>
    %c0_42 = arith.constant 0 : index
    %c0_43 = arith.constant 0 : index
    %96 = vector.load %arg13[%c0_42, %c0_43] : memref<8x128xf32, #tpu.memory_space<vmem>>, vector<8x128xf32>
    tpu.vector_store %arg13[%c0_42, %c0_43], %95 {strides = array<i32>} : memref<8x128xf32, #tpu.memory_space<vmem>>, vector<8x128xf32>,
    %c1_i32 = arith.constant 1 : i32
    %97 = arith.cmpi eq, %arg1, %c1_i32 : i32
    %98 = arith.extui %97 : i1 to i32
    %c0_i32_44 = arith.constant 0 : i32
    %99 = arith.cmpi ne, %98, %c0_i32_44 : i32
    scf.if %99 {
      %c0_45 = arith.constant 0 : index
      %c0_46 = arith.constant 0 : index
      %100 = vector.load %arg11[%c0_45, %c0_46] : memref<1x128xf32, #tpu.memory_space<vmem>>, vector<1x128xf32>
      %101 = arith.mulf %95, %95 : vector<8x128xf32>
      %cst_47 = arith.constant dense<0.000000e+00> : vector<8xf32>
      %102 = vector.multi_reduction <add>, %101, %cst_47 [1] : vector<8x128xf32> to vector<8xf32>
      %103 = vector.shape_cast %102 : vector<8xf32> to vector<8x1xf32>
      %cst_48 = arith.constant 3.125000e-02 : f32
      %104 = vector.broadcast %cst_48 : f32 to vector<8x1xf32>
      %105 = arith.mulf %103, %104 : vector<8x1xf32>
      %cst_49 = arith.constant 9.99999997E-7 : f32
      %106 = vector.broadcast %cst_49 : f32 to vector<8x1xf32>
      %107 = arith.addf %105, %106 : vector<8x1xf32>
      %108 = math.rsqrt %107 : vector<8x1xf32>
      %109 = vector.broadcast %108 : vector<8x1xf32> to vector<8x128xf32>
      %110 = arith.mulf %95, %109 : vector<8x128xf32>
      %111 = vector.broadcast %100 : vector<1x128xf32> to vector<8x128xf32>
      %112 = arith.mulf %110, %111 : vector<8x128xf32>
      %113 = vector.shape_cast %112 : vector<8x128xf32> to vector<1x8x128xf32>
      %114 = vector.shape_cast %4 : vector<1x8xf32> to vector<1x8x1xf32>
      %115 = vector.broadcast %114 : vector<1x8x1xf32> to vector<1x8x128xf32>
      %116 = arith.mulf %113, %115 : vector<1x8x128xf32>
      %cst_50 = arith.constant dense<0.000000e+00> : vector<1x128xf32>
      %117 = vector.multi_reduction <add>, %116, %cst_50 [1] : vector<1x8x128xf32> to vector<1x128xf32>
      %cst_51 = arith.constant dense<0.000000e+00> : vector<1xf32>
      %118 = vector.multi_reduction <add>, %4, %cst_51 [1] : vector<1x8xf32> to vector<1xf32>
      %119 = vector.shape_cast %118 : vector<1xf32> to vector<1x1xf32>
      %cst_52 = arith.constant 1.000000e+00 : f32
      %120 = vector.broadcast %cst_52 : f32 to vector<1x1xf32>
      %121 = arith.maximumf %119, %120 : vector<1x1xf32>
      %122 = vector.broadcast %121 : vector<1x1xf32> to vector<1x128xf32>
      %123 = arith.divf %117, %122 : vector<1x128xf32>
      %124 = vector.shape_cast %123 : vector<1x128xf32> to vector<1x1x128xf32>
      %c0_53 = arith.constant 0 : index
      %c0_54 = arith.constant 0 : index
      %c0_55 = arith.constant 0 : index
      %125 = vector.load %arg12[%c0_53, %c0_54, %c0_55] : memref<1x1x128xf32, #tpu.memory_space<vmem>>, vector<1x1x128xf32>
      tpu.vector_store %arg12[%c0_53, %c0_54, %c0_55], %124 {strides = array<i32>} : memref<1x1x128xf32, #tpu.memory_space<vmem>>, vector<1x1x128xf32>,
    } else {
    }
    return
  }
  func.func @transform_0(%arg0: i32, %arg1: i32) -> (i32, i32, i32) {
    %c0_i32 = arith.constant 0 : i32
    %c0_i32_0 = arith.constant 0 : i32
    %c0_i32_1 = arith.constant 0 : i32
    return %arg0, %c0_i32, %c0_i32_0 : i32, i32, i32
  }
  func.func @transform_1(%arg0: i32, %arg1: i32) -> (i32, i32, i32) {
    %c0_i32 = arith.constant 0 : i32
    %c0_i32_0 = arith.constant 0 : i32
    %c0_i32_1 = arith.constant 0 : i32
    return %arg0, %c0_i32, %c0_i32_0 : i32, i32, i32
  }
  func.func @transform_2(%arg0: i32, %arg1: i32) -> (i32, i32, i32) {
    %c0_i32 = arith.constant 0 : i32
    %c0_i32_0 = arith.constant 0 : i32
    %c0_i32_1 = arith.constant 0 : i32
    %c0_i32_2 = arith.constant 0 : i32
    return %c0_i32, %c0_i32_0, %c0_i32_1 : i32, i32, i32
  }
  func.func @transform_3(%arg0: i32, %arg1: i32) -> (i32, i32, i32) {
    %c0_i32 = arith.constant 0 : i32
    %c0_i32_0 = arith.constant 0 : i32
    %c0_i32_1 = arith.constant 0 : i32
    return %arg1, %c0_i32, %c0_i32_0 : i32, i32, i32
  }
  func.func @transform_4(%arg0: i32, %arg1: i32) -> (i32, i32, i32) {
    %c0_i32 = arith.constant 0 : i32
    %c0_i32_0 = arith.constant 0 : i32
    %c0_i32_1 = arith.constant 0 : i32
    return %arg1, %c0_i32, %c0_i32_0 : i32, i32, i32
  }
  func.func @transform_5(%arg0: i32, %arg1: i32) -> (i32, i32, i32) {
    %c0_i32 = arith.constant 0 : i32
    %c0_i32_0 = arith.constant 0 : i32
    %c0_i32_1 = arith.constant 0 : i32
    return %arg1, %c0_i32, %c0_i32_0 : i32, i32, i32
  }
  func.func @transform_6(%arg0: i32, %arg1: i32) -> (i32, i32, i32) {
    %c0_i32 = arith.constant 0 : i32
    %c0_i32_0 = arith.constant 0 : i32
    %c0_i32_1 = arith.constant 0 : i32
    return %arg1, %c0_i32, %c0_i32_0 : i32, i32, i32
  }
  func.func @transform_7(%arg0: i32, %arg1: i32) -> (i32, i32, i32) {
    %c0_i32 = arith.constant 0 : i32
    %c0_i32_0 = arith.constant 0 : i32
    %c0_i32_1 = arith.constant 0 : i32
    return %arg1, %c0_i32, %c0_i32_0 : i32, i32, i32
  }
  func.func @transform_8(%arg0: i32, %arg1: i32) -> (i32, i32, i32) {
    %c0_i32 = arith.constant 0 : i32
    %c0_i32_0 = arith.constant 0 : i32
    %c0_i32_1 = arith.constant 0 : i32
    return %arg1, %c0_i32, %c0_i32_0 : i32, i32, i32
  }
  func.func @transform_9(%arg0: i32, %arg1: i32) -> (i32, i32) {
    %c0_i32 = arith.constant 0 : i32
    %c0_i32_0 = arith.constant 0 : i32
    %c0_i32_1 = arith.constant 0 : i32
    return %c0_i32, %c0_i32_0 : i32, i32
  }
  func.func @transform_10(%arg0: i32, %arg1: i32) -> (i32, i32, i32) {
    %c0_i32 = arith.constant 0 : i32
    %c0_i32_0 = arith.constant 0 : i32
    %c0_i32_1 = arith.constant 0 : i32
    return %arg0, %c0_i32, %c0_i32_0 : i32, i32, i32
  }
}

</mosaic_0001>

<bundles_post_ra>
// kernel: t5_link_pred_forward.1
= control target key start
LH: loop header
LB: loop body
LE: loop exit
PB: predicated region body
PF: predicated region fallthrough
CT: control target
= control target key end

     0   :  { %s7880_s0 = inlined_call_operand.vmem [shape: f32[2,8,128], index: 0, kind: input, shape index: {}]   ;;  %s7881_s1 = inlined_call_operand.vmem [shape: f32[2,1,8], index: 1, kind: input, shape index: {}]   ;;  %s7882_s2 = inlined_call_operand.vmem [shape: f32[16,8,8], index: 2, kind: input, shape index: {}]   ;;  %s7883_s3 = inlined_call_operand.vmem [shape: f32[2,1,128], index: 3, kind: input, shape index: {}]   ;;  %s7884_s4 = inlined_call_operand.vmem [shape: bf16[2,128,384], index: 4, kind: input, shape index: {}]   ;;  %s7885_s5 = inlined_call_operand.vmem [shape: bf16[2,128,128], index: 5, kind: input, shape index: {}]   ;;  %s7886_s6 = inlined_call_operand.vmem [shape: f32[2,1,128], index: 6, kind: input, shape index: {}]   ;;  %s7887_s7 = inlined_call_operand.vmem [shape: bf16[2,128,128], index: 7, kind: input, shape index: {}]   ;;  %s7888_s8 = inlined_call_operand.vmem [shape: bf16[2,128,128], index: 8, kind: input, shape index: {}]   ;;  %s7889_s9 = inlined_call_operand.vmem [shape: f32[1,128], index: 9, kind: input, shape index: {}]   ;;  %s7890_s10 = inlined_call_operand.hbm [shape: f32[2,1,128], index: 10, kind: output, shape index: {}]  }
   0x1   :  { %7910 = sst [smem:[#allocation17_spill]] %s7880_s0 }
   0x2   :  { %7911 = sst [smem:[#allocation18_spill]] %s7890_s10 }
   0x3   :  { %15 = vsyncpa [#allocation4], 0 }
   0x4   :  { %17 = vsyncpa [#allocation4 + $0x1], 0  ;;  %s6387_s13 = smov 0   ;;  %s6389_s14 = smov 0  }
   0x5   :  { %s6391_s15 = smov 0   ;;  %s6393_s16 = smov 0  }
   0x6   :  { %s6395_s17 = smov 0   ;;  %s6397_s18 = smov 0  }
   0x7   :  { %s6399_s19 = smov 0   ;;  %s6401_s20 = smov 0  }
   0x8 LB: > { %7912 = sst [smem:[#allocation6_spill]] %s6281_s13  ;;  %s5456_s21 = sadd.s32 4294967295, %s6309_s20   ;;  %s6309_s20 = sphi %s6401_s20, %s23_s20   ;;  %s6305_s19 = sphi %s6399_s19, %s7948_s19   ;;  %s6301_s18 = sphi %s6397_s18, %s7947_s18   ;;  %s6297_s17 = sphi %s6395_s17, %s7946_s17   ;;  %s6293_s16 = sphi %s6393_s16, %s7945_s16   ;;  %s6289_s15 = sphi %s6391_s15, %s7944_s15   ;;  %s6285_s14 = sphi %s6389_s14, %s7950_s14   ;;  %s6281_s13 = sphi %s6387_s13, %s7949_s13  }
   0x9   : > { %7913 = sst [smem:[#allocation7_spill]] %s6289_s15  ;;  %s5457_s22 = sadd.s32 4294967294, %s6309_s20  }
   0xa   : > { %7914 = sst [smem:[#allocation8_spill]] %s6297_s17  ;;  %s32_s23 = sadd.s32 1, %s6301_s18 }
   0xb   : > { %7915 = sst [smem:[#allocation9_spill]] %s6301_s18  ;;  %p33_p0 = scmp.ge.s32.totalorder %s32_s23, 2 }
   0xc   : > { %7916 = sst [smem:[#allocation10_spill]] %s6305_s19  ;;  %s35_s24 = sadd.s32 1, %s6305_s19 }
   0xd   : > { %7917 = sst [smem:[#allocation11_spill]] %s6309_s20  ;;  %p302_p1 = scmp.ne.s32.totalorder %s6289_s15, %s6285_s14 }
   0xe   : > { %p303_p2 = scmp.eq.s32.totalorder %s5456_s21, 3  ;;  %s7952_s23 = smov (%p33_p0, %s32_s23), 0 }
   0xf   : > { %7918 = sst [smem:[#allocation12_spill]] %s7952_s23  ;;  %s7954_s24 = smov (!%p33_p0, %s35_s24), %s6305_s19 }
  0x10   : > { %p6436_p3 = por %p303_p2, %p302_p1  ;;  %p308_p4 = scmp.ne.s32.totalorder %s6285_s14, %s6281_s13 }
  0x11   : > { %p37_p5 = scmp.ge.s32.totalorder %s7954_s24, 2  ;;  %p309_p6 = scmp.eq.s32.totalorder %s5457_s22, 3 }
  0x12   : > { %s7919_s25 = scalar_select %p6436_p3, 1, 0 }
  0x13   : > { %p5460_p7 = scmp.ge.s32.totalorder %s6309_s20, 1  ;;  %p390_p8 = scmp.lt.s32.totalorder %s6309_s20, 5 }
  0x14   : > { %7920 = sst [smem:[#allocation13_spill]] %s7919_s25  ;;  %s7956_s24 = smov (%p37_p5, %s7954_s24), 0 }
  0x15   : > { %7921 = sst [smem:[#allocation14_spill]] %s7956_s24  ;;  %p6446_p9 = por %p309_p6, %p308_p4 }
  0x16   : > { %p391_p10 = pnand %p5460_p7, %p390_p8  ;;  %s289_s27 = ssub.s32 %s6305_s19, %s7956_s24 }
  0x17   : > { %s7922_s26 = scalar_select %p6446_p9, 1, 0 }
  0x18   : > { %s292_s28 = sadd.s32 1, %s6289_s15  ;;  %p290_p11 = scmp.eq.s32.totalorder %s289_s27, 0 }
  0x19   : > { %7923 = sst [smem:[#allocation15_spill]] %s7922_s26  ;;  %394 = sbr.rel (%p391_p10) target bundleno = 2492 (0x9bc), region = 60 }
  0x1a   : > { %s6454_s29 = scalar_select %p290_p11, %s6289_s15, %s292_s28  }
  0x1b   : > { %p455_p12 = scmp.lt.s32.totalorder (!%p391_p10), %s6297_s17, 1  ;;  %p462_p13 = scmp.lt.s32.totalorder (!%p391_p10), %s6293_s16, 1 }
  0x1c   : > { %7924 = sst [smem:[#allocation16_spill]] %s6454_s29  ;;  %s7926_s20 = sand.u32 (!%p391_p10), 1, %s6285_s14  }
  0x1d   : > { %s7925_s0 = sld [smem:[#allocation17_spill]] (!%p391_p10)  ;;  %p5469_p0 = scmp.ne.s32.totalorder (!%p391_p10), %s6293_s16, 0 }
  0x1e   : > { %s6460_s11 = scalar_select %p455_p12, %s6297_s17, 1 }
  0x1f   : > { %s6463_s12 = scalar_select %p462_p13, %s6293_s16, 1 }
  0x20   : > { %s5461_s21 = sshll.u32 %s6460_s11, 3  ;;  %492 = sbr.rel (%p5469_p0) target bundleno = 39 (0x27), region = 64 }
  0x21   : > { %s5996_s15 = smul.u32 192, %s6463_s12  ;;  %s5621_s26 = sshll.u32 %s6463_s12, 6 }
  0x22   : > { %s6482_s10 = scalar_lea.vmem %s7885_s5, %s5621_s26  ;;  %s6496_s18 = scalar_lea.vmem %s7887_s7, %s5621_s26 }
  0x23   : > { %s458_s23 = scalar_lea.vmem %s7925_s0, %s5461_s21  ;;  %s6491_s24 = scalar_lea.vmem %s7884_s4, %s5996_s15 }
  0x24   : > { %s6501_s13 = scalar_lea.vmem %s7888_s8, %s5621_s26  ;;  %s6505_s0 = scalar_lea.vmem [#allocation3], %s7926_s20 }
  0x25   : > { %v493_v0 = vld [vmem:[%s458_s23] sm:$0xff] }
  0x26   : > { %494 = vst [vmem:[#allocation2] sm:$0xff] %v493_v0 }
  0x27 PF: > { %v6088_v3 = vld [vmem:[%s6491_s24 + $0xac] ss:$12 sps:$4 sm:$0xff]   ;;  %v6311_v4 = vmov 0.0   ;;  %v6090_v5 = vld [vmem:[%s6491_s24 + $0xa8] ss:$12 sps:$4 sm:$0xff]   ;;  %v6312_v25 = vmov 0   ;;  %s7927_s23 = scalar_lea.vmem %s7883_s3, %s6463_s12  ;;  %v807_v47 = vlaneseq }
  0x28   : > { %5724 = vmatprep.subr.bf16.mxu1 %v6311_v4  ;;  %v6091_v6 = vld [vmem:[%s6491_s24 + $0xb0] ss:$12 sps:$4 sm:$0xff]   ;;  %675 = vmatprep.subr.bf16.mxu0 %v6088_v3  ;;  %v6092_v7 = vld [vmem:[%s6491_s24 + $0x94] ss:$12 sps:$4 sm:$0xff]   ;;  %v6095_v9 = vld [vmem:[%s6491_s24 + $0x98] ss:$12 sps:$4 sm:$0xff]  }
  0x29   : > { %v6094_v8 = vld [vmem:[%s6491_s24 + $0x90] ss:$12 sps:$4 sm:$0xff]   ;;  %676 = vmatpush1.bf16.msra.mxu0 %v6090_v5  ;;  %5725 = vmatpush3.bf16.msra.mxu1 %v6091_v6  ;;  %v6098_v11 = vld [vmem:[%s6491_s24 + $0x78] ss:$12 sps:$4 sm:$0xff]   ;;  %v6099_v12 = vld [vmem:[%s6491_s24 + $0x80] ss:$12 sps:$4 sm:$0xff]  }
  0x2a   : > { %677 = vmatprep.subr.bf16.mxu0 %v6092_v7  ;;  %5726 = vmatprep.subr.bf16.mxu1 %v6311_v4  ;;  %v6096_v10 = vld [vmem:[%s6491_s24 + $0x7c] ss:$12 sps:$4 sm:$0xff]   ;;  %v6100_v13 = vld [vmem:[%s6491_s24 + $0x64] ss:$12 sps:$4 sm:$0xff]   ;;  %v6102_v14 = vld [vmem:[%s6491_s24 + $0x60] ss:$12 sps:$4 sm:$0xff]  }
  0x2b   : > { %v6103_v15 = vld [vmem:[%s6491_s24 + $0x68] ss:$12 sps:$4 sm:$0xff]   ;;  %v6104_v16 = vld [vmem:[%s6491_s24 + $0x4c] ss:$12 sps:$4 sm:$0xff]   ;;  %v6107_v18 = vld [vmem:[%s6491_s24 + $0x50] ss:$12 sps:$4 sm:$0xff]   ;;  %707 = vmatprep.mubr.bf16.mxu0 %v6312_v25 }
  0x2c   : > { %v6106_v17 = vld [vmem:[%s6491_s24 + $0x48] ss:$12 sps:$4 sm:$0xff]   ;;  %v6110_v20 = vld [vmem:[%s6491_s24 + $0x30] ss:$12 sps:$4 sm:$0xff]   ;;  %v6111_v21 = vld [vmem:[%s6491_s24 + $0x38] ss:$12 sps:$4 sm:$0xff]  }
  0x2d   : > { %v6508_v1 = vld [vmem:[#allocation2] sm:$0xff]  ;;  %678 = vmatpush1.bf16.msra.mxu0 %v6094_v8  ;;  %5727 = vmatpush3.bf16.msra.mxu1 %v6095_v9  ;;  %v6112_v22 = vld [vmem:[%s6491_s24 + $0x1c] ss:$12 sps:$4 sm:$0xff]   ;;  %vm6313_vm0 = vmmov 0   ;;  %s7906_s25 = smov 120   ;;  %s7905_s26 = smov 112  }
  0x2e   : > { %v500_v2 = vmul.f32 %v6508_v1, %v6508_v1  ;;  %5728 = vmatprep.subr.bf16.mxu1 %v6311_v4  ;;  %679 = vmatprep.subr.bf16.mxu0 %v6096_v10  ;;  %v6108_v19 = vld [vmem:[%s6491_s24 + $0x34] ss:$12 sps:$4 sm:$0xff]   ;;  %v6114_v23 = vld [vmem:[%s6491_s24 + $0x18] ss:$12 sps:$4 sm:$0xff]   ;;  %s7909_s29 = smov 80   ;;  %s7908_s28 = smov 104  }
  0x2f   : > { %v6115_v24 = vld [vmem:[%s6491_s24 + $0x20] ss:$12 sps:$4 sm:$0xff]   ;;  %5740 = vmatprep.mubr.msk.bf16.mxu1 %vm6313_vm0, %v6311_v4  ;;  %v6116_v26 = vld [vmem:[%s6491_s24 + $0x4] ss:$12 sps:$4 sm:$0xff]   ;;  %v6119_v28 = vld [vmem:[%s6491_s24 + $0x8] ss:$12 sps:$4 sm:$0xff]  }
  0x30   : > { %501 = vadd.xlane.f32.xlu0 %v500_v2  ;;  %v6118_v27 = vld [vmem:[%s6491_s24] ss:$12 sps:$4 sm:$0xff]   ;;  %s7907_s27 = smov 96   ;;  %s6319_s24 = smov 64   ;;  %v6329_v45 = vmov 1983009808  }
  0x31   : > { %680 = vmatpush1.bf16.msra.mxu0 %v6098_v11  ;;  %5729 = vmatpush3.bf16.msra.mxu1 %v6099_v12  ;;  %v5470_v33 = vld [vmem:[%s7927_s23] ss:$0 sm:$0xff]  ;;  %s6320_s30 = smov 48   ;;  %s6321_s21 = smov 88   ;;  %v805_v46 = vunpack.c.l.s4 %v6329_v45  ;;  %v6330_v50 = vmov 1934713408  }
  0x32   : > { %5730 = vmatprep.subr.bf16.mxu1 %v6311_v4  ;;  %681 = vmatprep.subr.bf16.mxu0 %v6100_v13  ;;  %s6322_s19 = smov 72   ;;  %s6323_s20 = smov 32   ;;  %v869_v51 = vunpack.c.l.s4 %v6330_v50  ;;  %v6646_v53 = vshrl.u32 %v807_v47, 7  ;;  %vm2574_vm1 = vcmask 64512   ;;  %vm3560_vm2 = vcmask 1043456  }
  0x33   : > { %s7903_s15 = smov 16   ;;  %s6325_s17 = smov 56   ;;  %v806_v52 = vunpack.c.0.s8 %v805_v46  ;;  %vm4899_vm3 = vcmask 130048   ;;  %vm4901_vm4 = vcmask 195584   ;;  %vm4903_vm5 = vcmask 261120  }
  0x34   : > { %s6326_s23 = smov 40   ;;  %s6327_s22 = smov 24   ;;  %v870_v56 = vunpack.c.0.s8 %v869_v51  ;;  %vm4905_vm6 = vcmask 326656   ;;  %vm4907_vm7 = vcmask 392192   ;;  %vm4909_vm8 = vcmask 457728  }
  0x35   : > { %682 = vmatpush1.bf16.msra.mxu0 %v6102_v14  ;;  %5731 = vmatpush3.bf16.msra.mxu1 %v6103_v15  ;;  %v6651_v57 = vsub.s32 %v806_v52, %v6646_v53  ;;  %vm4911_vm9 = vcmask 523264   ;;  %vm4913_vm10 = vcmask 588800   ;;  %vm4915_vm11 = vcmask 654336   ;;  %p5616_p1 = scmp.ne.s32.totalorder %s6293_s16, 1 }
  0x36   : > { %683 = vmatprep.subr.bf16.mxu0 %v6104_v16  ;;  %5732 = vmatprep.subr.bf16.mxu1 %v6311_v4  ;;  %v6656_v63 = vsub.s32 %v870_v56, %v6646_v53  ;;  %vm4917_vm12 = vcmask 719872   ;;  %vm4919_vm13 = vcmask 785408   ;;  %vm4921_vm14 = vcmask 850944  }
  0x37   : > { %vm4923_vm15 = vcmask 916480  }
  0x39   : > { %684 = vmatpush1.bf16.msra.mxu0 %v6106_v17  ;;  %5733 = vmatpush3.bf16.msra.mxu1 %v6107_v18 }
  0x3a   : > { %685 = vmatprep.subr.bf16.mxu0 %v6108_v19  ;;  %5734 = vmatprep.subr.bf16.mxu1 %v6311_v4 }
  0x3d   : > { %686 = vmatpush1.bf16.msra.mxu0 %v6110_v20  ;;  %5735 = vmatpush3.bf16.msra.mxu1 %v6111_v21 }
  0x3e   : > { %687 = vmatprep.subr.bf16.mxu0 %v6112_v22  ;;  %5736 = vmatprep.subr.bf16.mxu1 %v6311_v4 }
  0x41   : > { %688 = vmatpush1.bf16.msra.mxu0 %v6114_v23  ;;  %5737 = vmatpush3.bf16.msra.mxu1 %v6115_v24 }
  0x42   : > { %689 = vmatprep.subr.bf16.mxu0 %v6116_v26  ;;  %5738 = vmatprep.subr.bf16.mxu1 %v6311_v4 }
  0x45   : > { %690 = vmatpush1.bf16.msra.mxu0 %v6118_v27  ;;  %5739 = vmatpush3.bf16.msra.mxu1 %v6119_v28 }
  0x46   : > { %5744 = vmatprep.subr.bf16.mxu1 %v6311_v4  ;;  %5768 = vmatprep.subr.bf16.mxu0 %v6311_v4 }
  0xb9   : > { %v502_v29 = vpop.xlane.xlu0 %501 }
  0xba   : > { %v503_v30 = vmul.f32 0.03125, %v502_v29 }
  0xbc   : > { %v504_v31 = vadd.f32 1e-06, %v503_v30 }
  0xbe   : > { %6144 = vrsqrt.f32 %v504_v31 }
  0xcb   : > { %v6145_v32 = vpop.eup %6144 }
  0xcc   : > { %v506_v34 = vmul.f32 %v6145_v32, %v6508_v1 }
  0xce   : > { %v513_v35 = vmul.f32 %v5470_v33, %v506_v34 }
  0xd0   : > { %v514_v36 = vpack.c.bf16 %v513_v35, %v513_v35 }
  0xd2   : > { %708 = vmatmul.mubr.bf16.vlgmr.msra.gmra.mxu0 %v514_v36  ;;  %5741 = vmatmul.mubr.bf16.vlgmr.msra.gmra.mxu1 %v514_v36 }
  0xd3   : > { %5746 = vmatprep.mubr.msk.bf16.mxu1 %vm6313_vm0, %v6311_v4  ;;  %5770 = vmatprep.mubr.msk.bf16.mxu0 %vm6313_vm0, %v6311_v4 }
 0x192   : > { %v6558_v37 = vpop.f32.mrf.mxu0  ;;  %v6560_v38 = vpop.f32.mrf.mxu1 }
 0x193   : > { %757 = vrot.lane.b32.xlu1 %v6558_v37, %s7906_s25 }
 0x194   : > { %v6564_v39 = vpop.f32.mrf.mxu0  ;;  %v5742_v40 = vpop.f32.mrf.mxu1 }
 0x195   : > { %1363 = vrot.lane.b32.xlu0 %v6564_v39, %s7906_s25 }
 0x196   : > { %v713_v41 = vpop.f32.mrf.mxu0  ;;  %v753_v42 = vpop.f32.mrf.mxu1 }
 0x197   : > { %1366 = vrot.lane.b32.xlu1 %v6564_v39, %s7905_s26 }
 0x198   : > { %v714_v43 = vpop.f32.mrf.mxu0  ;;  %v5743_v44 = vpop.f32.mrf.mxu1 }
 0x199   : > { %1378 = vrot.lane.b32.xlu0 %v6564_v39, %s7909_s29 }
 0x19b   : > { %1369 = vrot.lane.b32.xlu1 %v6564_v39, %s7908_s28 }
 0x19d   : > { %766 = vrot.lane.b32.xlu0 %v6558_v37, %s7907_s27 }
 0x19f   : > { %760 = vrot.lane.b32.xlu1 %v6558_v37, %s7905_s26 }
 0x1a1   : > { %772 = vrot.lane.b32.xlu0 %v6558_v37, %s7909_s29 }
 0x1a3   : > { %763 = vrot.lane.b32.xlu1 %v6558_v37, %s7908_s28 }
 0x1a5   : > { %1384 = vrot.lane.b32.xlu0 %v6564_v39, %s6319_s24 }
 0x1a7   : > { %1372 = vrot.lane.b32.xlu1 %v6564_v39, %s7907_s27 }
 0x1a9   : > { %1390 = vrot.lane.b32.xlu0 %v6564_v39, %s6320_s30 }
 0x1ab   : > { %1375 = vrot.lane.b32.xlu1 %v6564_v39, %s6321_s21 }
 0x1ad   : > { %778 = vrot.lane.b32.xlu0 %v6558_v37, %s6319_s24 }
 0x1af   : > { %1381 = vrot.lane.b32.xlu1 %v6564_v39, %s6322_s19 }
 0x1b1   : > { %784 = vrot.lane.b32.xlu0 %v6558_v37, %s6320_s30 }
 0x1b3   : > { %769 = vrot.lane.b32.xlu1 %v6558_v37, %s6321_s21 }
 0x1b5   : > { %1396 = vrot.lane.b32.xlu0 %v6564_v39, %s6323_s20 }
 0x1b7   : > { %775 = vrot.lane.b32.xlu1 %v6558_v37, %s6322_s19 }
 0x1b9   : > { %1402 = vrot.lane.b32.xlu0 %v6564_v39, %s7903_s15 }
 0x1bb   : > { %1387 = vrot.lane.b32.xlu1 %v6564_v39, %s6325_s17 }
 0x1bd   : > { %790 = vrot.lane.b32.xlu0 %v6558_v37, %s6323_s20 }
 0x1bf   : > { %1393 = vrot.lane.b32.xlu1 %v6564_v39, %s6326_s23 }
 0x1c1   : > { %796 = vrot.lane.b32.xlu0 %v6558_v37, %s7903_s15  ;;  %s6328_s15 = smov 8  }
 0x1c3   : > { %781 = vrot.lane.b32.xlu1 %v6558_v37, %s6325_s17 }
 0x1c5   : > { %1972 = vrot.lane.b32.xlu0 %v6560_v38, %s7905_s26 }
 0x1c7   : > { %787 = vrot.lane.b32.xlu1 %v6558_v37, %s6326_s23 }
 0x1c9   : > { %1978 = vrot.lane.b32.xlu0 %v6560_v38, %s7907_s27  ;;  %s7928_s27 = scalar_lea.vmem %s7881_s1, %s6460_s11  ;;  %s7929_s11 = smov 16  }
 0x1cb   : > { %1399 = vrot.lane.b32.xlu1 %v6564_v39, %s6327_s22 }
 0x1cd   : > { %1987 = vrot.lane.b32.xlu0 %v6560_v38, %s6322_s19 }
 0x1cf   : > { %1405 = vrot.lane.b32.xlu1 %v6564_v39, %s6328_s15 }
 0x1d1   : > { %1990 = vrot.lane.b32.xlu0 %v6560_v38, %s6319_s24 }
 0x1d3   : > { %793 = vrot.lane.b32.xlu1 %v6558_v37, %s6327_s22 }
 0x1d5   : > { %1999 = vrot.lane.b32.xlu0 %v6560_v38, %s6326_s23 }
 0x1d7   : > { %799 = vrot.lane.b32.xlu1 %v6558_v37, %s6328_s15 }
 0x1db   : > { %1969 = vrot.lane.b32.xlu1 %v6560_v38, %s7906_s25 }
 0x1df   : > { %1975 = vrot.lane.b32.xlu1 %v6560_v38, %s7908_s28 }
 0x1e3   : > { %1981 = vrot.lane.b32.xlu1 %v6560_v38, %s6321_s21 }
 0x1e7   : > { %1984 = vrot.lane.b32.xlu1 %v6560_v38, %s7909_s29 }
 0x1eb   : > { %1993 = vrot.lane.b32.xlu1 %v6560_v38, %s6325_s17 }
 0x1ef   : > { %1996 = vrot.lane.b32.xlu1 %v6560_v38, %s6320_s30 }
 0x205   : > { %v758_v48 = vpop.permute.xlu1 %757 }
 0x207   : > { %v1364_v49 = vpop.permute.xlu0 %1363 }
 0x209   : > { %v1367_v54 = vpop.permute.xlu1 %1366 }
 0x20a   : > { %v1408_v58 = vcombine.low %v6564_v39, %v1367_v54  ;;  %v1409_v59 = vcombine.high %v6564_v39, %v1367_v54 }
 0x20b   : > { %v6648_v55 = vpop.permute.xlu0 %1378 }
 0x20c   : > { %v1416_v1 = vrot.slane %v1408_v58, %v6651_v57  ;;  %v1423_v2 = vrot.slane %v1409_v59, %v6651_v57 }
 0x20d   : > { %v1370_v60 = vpop.permute.xlu1 %1369 }
 0x20e   : > { %v1424_v61 = vcombine.low %v1364_v49, %v1370_v60  ;;  %v1425_v62 = vcombine.high %v1364_v49, %v1370_v60 }
 0x20f   : > { %v767_v0 = vpop.permute.xlu0 %766 }
 0x210   : > { %v1432_v3 = vrot.slane %v1424_v61, %v6651_v57  ;;  %v1439_v5 = vrot.slane %v1425_v62, %v6651_v57 }
 0x211   : > { %v761_v6 = vpop.permute.xlu1 %760 }
 0x212   : > { %v1472_v7 = vcombine.low %v1416_v1, %v1432_v3  ;;  %v1473_v8 = vcombine.high %v1416_v1, %v1432_v3  ;;  %v1488_v9 = vcombine.low %v1423_v2, %v1439_v5  ;;  %v1489_v10 = vcombine.high %v1423_v2, %v1439_v5 }
 0x213   : > { %v773_v11 = vpop.permute.xlu0 %772  ;;  %v802_v16 = vcombine.low %v6558_v37, %v761_v6  ;;  %v803_v17 = vcombine.high %v6558_v37, %v761_v6 }
 0x214   : > { %v1480_v12 = vrot.slane %v1472_v7, %v6656_v63  ;;  %v1487_v13 = vrot.slane %v1473_v8, %v6656_v63  ;;  %v1496_v14 = vrot.slane %v1488_v9, %v6656_v63  ;;  %v1503_v15 = vrot.slane %v1489_v10, %v6656_v63 }
 0x215   : > { %v764_v18 = vpop.permute.xlu1 %763  ;;  %v834_v23 = vcombine.low %v767_v0, %v773_v11  ;;  %v835_v24 = vcombine.high %v767_v0, %v773_v11  ;;  %v810_v32 = vrot.slane %v802_v16, %v6651_v57  ;;  %v817_v33 = vrot.slane %v803_v17, %v6651_v57 }
 0x216   : > { %v5511_v19 = vcombine.low %v1480_v12, %v1487_v13  ;;  %v5513_v20 = vcombine.high %v1480_v12, %v1487_v13  ;;  %v5515_v21 = vcombine.low %v1496_v14, %v1503_v15  ;;  %v5517_v22 = vcombine.high %v1496_v14, %v1503_v15 }
 0x217   : > { %v818_v25 = vcombine.low %v758_v48, %v764_v18  ;;  %v819_v26 = vcombine.high %v758_v48, %v764_v18  ;;  %v1385_v27 = vpop.permute.xlu0 %1384  ;;  %v6689_v45 = vrot.slane %v834_v23, %v6651_v57  ;;  %v6692_v46 = vrot.slane %v835_v24, %v6651_v57 }
 0x218   : > { %v6669_v28 = vrot.slane %v5511_v19, %v6651_v57  ;;  %v6672_v29 = vrot.slane %v5513_v20, %v6651_v57  ;;  %v6675_v30 = vrot.slane %v5515_v21, %v6651_v57  ;;  %v6678_v31 = vrot.slane %v5517_v22, %v6651_v57 }
 0x219   : > { %v826_v34 = vrot.slane %v818_v25, %v6651_v57  ;;  %v833_v35 = vrot.slane %v819_v26, %v6651_v57  ;;  %v1373_v36 = vpop.permute.xlu1 %1372 }
 0x21a   : > { %v1744_v37 = vcombine.low %v6669_v28, %v6672_v29  ;;  %v1776_v39 = vcombine.low %v6675_v30, %v6678_v31  ;;  %v1440_v47 = vcombine.low %v1373_v36, %v6648_v55  ;;  %v1441_v48 = vcombine.high %v1373_v36, %v6648_v55 }
 0x21b   : > { %v866_v40 = vcombine.low %v810_v32, %v826_v34  ;;  %v867_v41 = vcombine.high %v810_v32, %v826_v34  ;;  %v882_v42 = vcombine.low %v817_v33, %v833_v35  ;;  %v883_v43 = vcombine.high %v817_v33, %v833_v35  ;;  %v1391_v44 = vpop.permute.xlu0 %1390 }
 0x21c   : > { %v1544_v56 = vcombine.low %v1385_v27, %v1391_v44  ;;  %v1545_v58 = vcombine.high %v1385_v27, %v1391_v44  ;;  %v1752_v59 = vrot.slane %v1744_v37, %v6656_v63  ;;  %v1784_v60 = vrot.slane %v1776_v39, %v6656_v63 }
 0x21d   : > { %v874_v49 = vrot.slane %v866_v40, %v6656_v63  ;;  %v881_v50 = vrot.slane %v867_v41, %v6656_v63  ;;  %v890_v51 = vrot.slane %v882_v42, %v6656_v63  ;;  %v897_v52 = vrot.slane %v883_v43, %v6656_v63  ;;  %v1376_v54 = vpop.permute.xlu1 %1375 }
 0x21e   : > { %v1448_v2 = vrot.slane %v1440_v47, %v6651_v57  ;;  %v1455_v3 = vrot.slane %v1441_v48, %v6651_v57  ;;  %v1808_v5 = vcombine.low %v1752_v59, %v1784_v60  ;;  %v1809_v6 = vcombine.high %v1752_v59, %v1784_v60 }
 0x21f   : > { %v5495_v61 = vcombine.low %v874_v49, %v881_v50  ;;  %v5497_v62 = vcombine.high %v874_v49, %v881_v50  ;;  %v5499_v0 = vcombine.low %v890_v51, %v897_v52  ;;  %v5501_v1 = vcombine.high %v890_v51, %v897_v52  ;;  %v6702_v55 = vpop.permute.xlu0 %778 }
 0x220   : > { %v6719_v12 = vrot.slane %v1544_v56, %v6651_v57  ;;  %v1952_v15 = vpack.c.bf16 %v1808_v5, %v1808_v5  ;;  %v6726_v18 = vrot.slane %v1545_v58, %v6651_v57  ;;  %v1745_v20 = vcombine.high %v6669_v28, %v6672_v29 }
 0x221   : > { %v6707_v7 = vrot.slane %v5495_v61, %v6651_v57  ;;  %v6710_v8 = vrot.slane %v5497_v62, %v6651_v57  ;;  %v6713_v9 = vrot.slane %v5499_v0, %v6651_v57  ;;  %v6716_v10 = vrot.slane %v5501_v1, %v6651_v57  ;;  %v1382_v11 = vpop.permute.xlu1 %1381 }
 0x222   : > { %v1456_v13 = vcombine.low %v1376_v54, %v1382_v11  ;;  %v1457_v14 = vcombine.high %v1376_v54, %v1382_v11  ;;  %v2579_v23 = vsel %vm2574_vm1, %v1952_v15, 0  ;;  %v1777_v24 = vcombine.high %v6675_v30, %v6678_v31 }
 0x223   : > { %v1138_v16 = vcombine.low %v6707_v7, %v6710_v8  ;;  %v1170_v17 = vcombine.low %v6713_v9, %v6716_v10  ;;  %v785_v19 = vpop.permute.xlu0 %784  ;;  %v1139_v25 = vcombine.high %v6707_v7, %v6710_v8  ;;  %5745 = vmatpush3.bf16.xpose.msra.mxu1 %v2579_v23  ;;  %v1953_v33 = vpack.c.bf16 %v1809_v6, %v1809_v6 }
 0x224   : > { %v1464_v21 = vrot.slane %v1456_v13, %v6651_v57  ;;  %v1471_v22 = vrot.slane %v1457_v14, %v6651_v57  ;;  %5750 = vmatprep.subr.bf16.mxu1 %v6311_v4  ;;  %v1171_v36 = vcombine.high %v6713_v9, %v6716_v10  ;;  %v938_v30 = vcombine.low %v6702_v55, %v785_v19 }
 0x225   : > { %v770_v26 = vpop.permute.xlu1 %769  ;;  %v1146_v27 = vrot.slane %v1138_v16, %v6656_v63  ;;  %v1178_v32 = vrot.slane %v1170_v17, %v6656_v63  ;;  %v939_v31 = vcombine.high %v6702_v55, %v785_v19  ;;  %v6751_v49 = vrot.slane %v1745_v20, %v6656_v63 }
 0x226   : > { %v1504_v28 = vcombine.low %v1448_v2, %v1464_v21  ;;  %v1505_v29 = vcombine.high %v1448_v2, %v1464_v21  ;;  %v1520_v34 = vcombine.low %v1455_v3, %v1471_v22  ;;  %v1521_v35 = vcombine.high %v1455_v3, %v1471_v22 }
 0x227   : > { %v6744_v37 = vpop.permute.xlu0 %1396  ;;  %v1202_v39 = vcombine.low %v1146_v27, %v1178_v32  ;;  %v1203_v48 = vcombine.high %v1146_v27, %v1178_v32  ;;  %v6754_v50 = vrot.slane %v1777_v24, %v6656_v63  ;;  %v2625_v60 = vsel %vm2574_vm1, %v1953_v33, 0 }
 0x228   : > { %v1512_v40 = vrot.slane %v1504_v28, %v6656_v63  ;;  %v1519_v41 = vrot.slane %v1505_v29, %v6656_v63  ;;  %v1528_v42 = vrot.slane %v1520_v34, %v6656_v63  ;;  %v1535_v43 = vrot.slane %v1521_v35, %v6656_v63 }
 0x229   : > { %v776_v44 = vpop.permute.xlu1 %775  ;;  %v1346_v47 = vpack.c.bf16 %v1202_v39, %v1202_v39  ;;  %v1810_v62 = vcombine.low %v6751_v49, %v6754_v50  ;;  %v6773_v3 = vrot.slane %v938_v30, %v6651_v57  ;;  %v6776_v5 = vrot.slane %v939_v31, %v6651_v57 }
 0x22a   : > { %v5512_v51 = vcombine.low %v1512_v40, %v1519_v41  ;;  %v5514_v52 = vcombine.high %v1512_v40, %v1519_v41  ;;  %v5516_v54 = vcombine.low %v1528_v42, %v1535_v43  ;;  %v5518_v56 = vcombine.high %v1528_v42, %v1535_v43 }
 0x22b   : > { %v850_v58 = vcombine.low %v770_v26, %v776_v44  ;;  %v851_v59 = vcombine.high %v770_v26, %v776_v44  ;;  %v1403_v61 = vpop.permute.xlu0 %1402  ;;  %5747 = vmatmul.mubr.msk.bf16.vlgmr.msra.gmra.mxu1 %vm2574_vm1, %v1346_v47  ;;  %v1347_v11 = vpack.c.bf16 %v1203_v48, %v1203_v48  ;;  %v1954_v13 = vpack.c.bf16 %v1810_v62, %v1810_v62 }
 0x22c   : > { %v6760_v0 = vrot.slane %v5512_v51, %v6651_v57  ;;  %v6763_v1 = vrot.slane %v5514_v52, %v6651_v57  ;;  %v6766_v55 = vrot.slane %v5516_v54, %v6651_v57  ;;  %v6769_v2 = vrot.slane %v5518_v56, %v6651_v57  ;;  %5751 = vmatpush3.bf16.xpose.msra.mxu1 %v2625_v60 }
 0x22d   : > { %v858_v6 = vrot.slane %v850_v58, %v6651_v57  ;;  %v865_v7 = vrot.slane %v851_v59, %v6651_v57  ;;  %v1388_v8 = vpop.permute.xlu1 %1387  ;;  %5752 = vmatprep.mubr.msk.bf16.mxu1 %vm6313_vm0, %v6311_v4  ;;  %5756 = vmatprep.subr.bf16.mxu1 %v6311_v4  ;;  %v1576_v21 = vcombine.low %v6744_v37, %v1403_v61  ;;  %v2671_v29 = vsel %vm2574_vm1, %v1954_v13, 0 }
 0x22e   : > { %v1760_v14 = vcombine.low %v6760_v0, %v6763_v1  ;;  %v1577_v22 = vcombine.high %v6744_v37, %v1403_v61  ;;  %v1792_v23 = vcombine.low %v6766_v55, %v6769_v2  ;;  %v6794_v24 = vrot.slane %v1139_v25, %v6656_v63 }
 0x22f   : > { %v898_v15 = vcombine.low %v6689_v45, %v858_v6  ;;  %v899_v16 = vcombine.high %v6689_v45, %v858_v6  ;;  %v914_v17 = vcombine.low %v6692_v46, %v865_v7  ;;  %v915_v19 = vcombine.high %v6692_v46, %v865_v7  ;;  %v791_v20 = vpop.permute.xlu0 %790 }
 0x230   : > { %v6802_v34 = vrot.slane %v1760_v14, %v6656_v63  ;;  %v6808_v42 = vrot.slane %v1792_v23, %v6656_v63  ;;  %v6829_v59 = vrot.slane %v1576_v21, %v6651_v57  ;;  %v6832_v60 = vrot.slane %v1577_v22, %v6651_v57 }
 0x231   : > { %v906_v26 = vrot.slane %v898_v15, %v6656_v63  ;;  %v913_v27 = vrot.slane %v899_v16, %v6656_v63  ;;  %v922_v45 = vrot.slane %v914_v17, %v6656_v63  ;;  %v929_v32 = vrot.slane %v915_v19, %v6656_v63  ;;  %v1394_v46 = vpop.permute.xlu1 %1393 }
 0x232   : > { %v1560_v33 = vcombine.low %v1388_v8, %v1394_v46  ;;  %v1561_v28 = vcombine.high %v1388_v8, %v1394_v46  ;;  %v1812_v9 = vcombine.low %v6802_v34, %v6808_v42 }
 0x233   : > { %v5496_v35 = vcombine.low %v906_v26, %v913_v27  ;;  %v5498_v30 = vcombine.high %v906_v26, %v913_v27  ;;  %v5500_v25 = vcombine.low %v922_v45, %v929_v32  ;;  %v5502_v31 = vcombine.high %v922_v45, %v929_v32  ;;  %v797_v37 = vpop.permute.xlu0 %796  ;;  %5753 = vmatmul.mubr.msk.bf16.vlgmr.msra.gmra.mxu1 %vm2574_vm1, %v1347_v11 }
 0x234   : > { %v1568_v39 = vrot.slane %v1560_v33, %v6651_v57  ;;  %v1575_v40 = vrot.slane %v1561_v28, %v6651_v57  ;;  %v970_v41 = vcombine.low %v791_v20, %v797_v37  ;;  %5757 = vmatpush3.bf16.xpose.msra.mxu1 %v2671_v29  ;;  %5758 = vmatprep.mubr.msk.bf16.mxu1 %vm6313_vm0, %v6311_v4 }
 0x235   : > { %v6811_v43 = vrot.slane %v5496_v35, %v6651_v57  ;;  %v6814_v44 = vrot.slane %v5498_v30, %v6651_v57  ;;  %v6817_v47 = vrot.slane %v5500_v25, %v6651_v57  ;;  %v6820_v48 = vrot.slane %v5502_v31, %v6651_v57  ;;  %v782_v51 = vpop.permute.xlu1 %781  ;;  %5762 = vmatprep.subr.bf16.mxu1 %v6311_v4 }
 0x236   : > { %v1608_v52 = vcombine.low %v6719_v12, %v1568_v39  ;;  %v1609_v54 = vcombine.high %v6719_v12, %v1568_v39  ;;  %v1624_v56 = vcombine.low %v6726_v18, %v1575_v40  ;;  %v1625_v58 = vcombine.high %v6726_v18, %v1575_v40 }
 0x237   : > { %v971_v61 = vcombine.high %v791_v20, %v797_v37  ;;  %v6834_v62 = vpop.permute.xlu0 %1972  ;;  %v1185_v12 = vrot.slane %v1171_v36, %v6656_v63  ;;  %v1154_v11 = vcombine.low %v6811_v43, %v6814_v44  ;;  %v1155_v13 = vcombine.high %v6811_v43, %v6814_v44 }
 0x238   : > { %v1616_v18 = vrot.slane %v1608_v52, %v6656_v63  ;;  %v1623_v6 = vrot.slane %v1609_v54, %v6656_v63  ;;  %v6844_v7 = vrot.slane %v1624_v56, %v6656_v63  ;;  %v6847_v8 = vrot.slane %v1625_v58, %v6656_v63 }
 0x239   : > { %v2014_v10 = vcombine.low %v6560_v38, %v6834_v62  ;;  %v788_v36 = vpop.permute.xlu1 %787  ;;  %v1186_v14 = vcombine.low %v6817_v47, %v6820_v48  ;;  %v1187_v15 = vcombine.high %v6817_v47, %v6820_v48  ;;  %v6862_v17 = vrot.slane %v970_v41, %v6651_v57 }
 0x23a   : > { %v5519_v16 = vcombine.low %v1616_v18, %v1623_v6  ;;  %v5521_v19 = vcombine.high %v1616_v18, %v1623_v6  ;;  %v6865_v20 = vrot.slane %v971_v61, %v6651_v57  ;;  %v1956_v21 = vpack.c.bf16 %v1812_v9, %v1812_v9 }
 0x23b   : > { %v954_v22 = vcombine.low %v782_v51, %v788_v36  ;;  %v5523_v23 = vcombine.low %v6844_v7, %v6847_v8  ;;  %v5525_v26 = vcombine.high %v6844_v7, %v6847_v8  ;;  %v2015_v27 = vcombine.high %v6560_v38, %v6834_v62 }
 0x23c   : > { %v6874_v45 = vrot.slane %v2014_v10, %v6651_v57  ;;  %v6877_v32 = vrot.slane %v5519_v16, %v6651_v57  ;;  %v2763_v46 = vsel %vm2574_vm1, %v1956_v21, 0  ;;  %v955_v33 = vcombine.high %v782_v51, %v788_v36 }
 0x23d   : > { %v962_v28 = vrot.slane %v954_v22, %v6651_v57  ;;  %v1400_v29 = vpop.permute.xlu1 %1399  ;;  %5769 = vmatpush3.bf16.xpose.msra.mxu0 %v2763_v46  ;;  %v1204_v35 = vcombine.low %v6794_v24, %v1185_v12  ;;  %v1811_v30 = vcombine.high %v6751_v49, %v6754_v50  ;;  %v6885_v25 = vrot.slane %v1154_v11, %v6656_v63 }
 0x23e   : > { %v6888_v31 = vrot.slane %v1186_v14, %v6656_v63  ;;  %v969_v37 = vrot.slane %v955_v33, %v6651_v57  ;;  %5780 = vmatprep.subr.bf16.mxu0 %v6311_v4  ;;  %v1761_v41 = vcombine.high %v6760_v0, %v6763_v1  ;;  %v1793_v50 = vcombine.high %v6766_v55, %v6769_v2 }
 0x23f   : > { %v1002_v39 = vcombine.low %v6773_v3, %v962_v28  ;;  %v1003_v40 = vcombine.high %v6773_v3, %v962_v28  ;;  %v1348_v51 = vpack.c.bf16 %v1204_v35, %v1204_v35  ;;  %v1955_v52 = vpack.c.bf16 %v1811_v30, %v1811_v30 }
 0x240   : > { %v1206_v49 = vcombine.low %v6885_v25, %v6888_v31  ;;  %v1018_v58 = vcombine.low %v6776_v5, %v969_v37  ;;  %v1019_v3 = vcombine.high %v6776_v5, %v969_v37  ;;  %v6907_v62 = vrot.slane %v1761_v41, %v6656_v63 }
 0x241   : > { %v1010_v54 = vrot.slane %v1002_v39, %v6656_v63  ;;  %v1017_v56 = vrot.slane %v1003_v40, %v6656_v63  ;;  %v1406_v61 = vpop.permute.xlu1 %1405  ;;  %5759 = vmatmul.mubr.msk.bf16.vlgmr.msra.gmra.mxu1 %vm2574_vm1, %v1348_v51  ;;  %v2717_v0 = vsel %vm2574_vm1, %v1955_v52, 0  ;;  %v6910_v18 = vrot.slane %v1793_v50, %v6656_v63 }
 0x242   : > { %v1350_v1 = vpack.c.bf16 %v1206_v49, %v1206_v49  ;;  %v1026_v55 = vrot.slane %v1018_v58, %v6656_v63  ;;  %v1033_v2 = vrot.slane %v1019_v3, %v6656_v63  ;;  %5763 = vmatpush3.bf16.xpose.msra.mxu1 %v2717_v0  ;;  %v1592_v8 = vcombine.low %v1400_v29, %v1406_v61 }
 0x243   : > { %v5503_v6 = vcombine.low %v1010_v54, %v1017_v56  ;;  %v5505_v7 = vcombine.high %v1010_v54, %v1017_v56  ;;  %v1814_v5 = vcombine.low %v6907_v62, %v6910_v18  ;;  %v1593_v11 = vcombine.high %v1400_v29, %v1406_v61  ;;  %5764 = vmatprep.mubr.msk.bf16.mxu1 %vm6313_vm0, %v6311_v4 }
 0x244   : > { %v1205_v9 = vcombine.high %v6794_v24, %v1185_v12  ;;  %v6920_v10 = vrot.slane %v5521_v19, %v6651_v57  ;;  %v6923_v36 = vrot.slane %v5523_v23, %v6651_v57  ;;  %v5507_v14 = vcombine.low %v1026_v55, %v1033_v2  ;;  %5771 = vmatmul.mubr.msk.bf16.vlgmr.msra.gmra.mxu0 %vm2574_vm1, %v1350_v1 }
 0x245   : > { %v5509_v16 = vcombine.high %v1026_v55, %v1033_v2  ;;  %v794_v21 = vpop.permute.xlu1 %793  ;;  %v6927_v22 = vrot.slane %v5525_v26, %v6651_v57  ;;  %v1958_v46 = vpack.c.bf16 %v1814_v5, %v1814_v5  ;;  %v1600_v33 = vrot.slane %v1592_v8, %v6651_v57  ;;  %5774 = vmatprep.subr.bf16.mxu1 %v6311_v4 }
 0x246   : > { %v1607_v28 = vrot.slane %v1593_v11, %v6651_v57  ;;  %v6933_v24 = vrot.slane %v2015_v27, %v6651_v57  ;;  %v6936_v12 = vrot.slane %v5503_v6, %v6651_v57  ;;  %v6939_v19 = vrot.slane %v5505_v7, %v6651_v57  ;;  %5782 = vmatprep.mubr.msk.bf16.mxu0 %vm6313_vm0, %v6311_v4 }
 0x247   : > { %v1349_v23 = vpack.c.bf16 %v1205_v9, %v1205_v9  ;;  %v2855_v26 = vsel %vm2574_vm1, %v1958_v46, 0  ;;  %v1640_v29 = vcombine.low %v6829_v59, %v1600_v33  ;;  %v1641_v35 = vcombine.high %v6829_v59, %v1600_v33 }
 0x248   : > { %v1656_v30 = vcombine.low %v6832_v60, %v1607_v28  ;;  %v6948_v27 = vrot.slane %v5507_v14, %v6651_v57  ;;  %v6951_v37 = vrot.slane %v5509_v16, %v6651_v57  ;;  %5781 = vmatpush3.bf16.xpose.msra.mxu0 %v2855_v26  ;;  %v1657_v39 = vcombine.high %v6832_v60, %v1607_v28 }
 0x249   : > { %v1813_v40 = vcombine.high %v6802_v34, %v6808_v42  ;;  %v800_v41 = vpop.permute.xlu1 %799  ;;  %v6957_v51 = vrot.slane %v1640_v29, %v6656_v63  ;;  %v6960_v59 = vrot.slane %v1641_v35, %v6656_v63  ;;  %5765 = vmatmul.mubr.msk.bf16.vlgmr.msra.gmra.mxu1 %vm2574_vm1, %v1349_v23  ;;  %v6970_v60 = vrot.slane %v1155_v13, %v6656_v63  ;;  %v7040_v35 = vpop.permute.xlu0 %1978 }
 0x24a   : > { %v6963_v52 = vrot.slane %v1656_v30, %v6656_v63  ;;  %v6973_v34 = vrot.slane %v1657_v39, %v6656_v63  ;;  %v6979_v49 = vrot.slane %v1187_v15, %v6656_v63  ;;  %5792 = vmatprep.subr.bf16.mxu0 %v6311_v4  ;;  %v1880_v50 = vcombine.low %v6877_v32, %v6920_v10 }
 0x24b   : > { %v1957_v42 = vpack.c.bf16 %v1813_v40, %v1813_v40  ;;  %v1274_v43 = vcombine.low %v6936_v12, %v6939_v19  ;;  %v1275_v44 = vcombine.high %v6936_v12, %v6939_v19  ;;  %v1912_v13 = vcombine.low %v6923_v36, %v6927_v22  ;;  %5776 = vmatprep.mubr.msk.bf16.mxu1 %vm6313_vm0, %v6311_v4 }
 0x24c   : > { %v986_v54 = vcombine.low %v794_v21, %v800_v41  ;;  %v1306_v47 = vcombine.low %v6948_v27, %v6951_v37  ;;  %v1307_v48 = vcombine.high %v6948_v27, %v6951_v37  ;;  %v1208_v56 = vcombine.low %v6970_v60, %v6979_v49 }
 0x24d   : > { %v2809_v15 = vsel %vm2574_vm1, %v1957_v42, 0  ;;  %v1970_v58 = vpop.permute.xlu1 %1969  ;;  %v5520_v3 = vcombine.low %v6957_v51, %v6960_v59  ;;  %v5522_v61 = vcombine.high %v6957_v51, %v6960_v59  ;;  %v7004_v0 = vrot.slane %v1880_v50, %v6656_v63 }
 0x24e   : > { %5775 = vmatpush3.bf16.xpose.msra.mxu1 %v2809_v15  ;;  %v7007_v1 = vrot.slane %v1912_v13, %v6656_v63  ;;  %v5524_v55 = vcombine.low %v6963_v52, %v6973_v34  ;;  %v5526_v2 = vcombine.high %v6963_v52, %v6973_v34  ;;  %v1352_v6 = vpack.c.bf16 %v1208_v56, %v1208_v56 }
 0x24f   : > { %v987_v7 = vcombine.high %v794_v21, %v800_v41  ;;  %5786 = vmatprep.subr.bf16.mxu1 %v6311_v4  ;;  %v994_v8 = vrot.slane %v986_v54, %v6651_v57  ;;  %v1207_v11 = vcombine.high %v6885_v25, %v6888_v31  ;;  %v1815_v9 = vcombine.high %v6907_v62, %v6910_v18 }
 0x250   : > { %v1944_v5 = vcombine.low %v7004_v0, %v7007_v1  ;;  %5783 = vmatmul.mubr.msk.bf16.vlgmr.msra.gmra.mxu0 %vm2574_vm1, %v1352_v6  ;;  %v7024_v16 = vrot.slane %v1274_v43, %v6656_v63  ;;  %v7027_v21 = vrot.slane %v1306_v47, %v6656_v63  ;;  %v1881_v46 = vcombine.high %v6877_v32, %v6920_v10 }
 0x251   : > { %v1001_v14 = vrot.slane %v987_v7, %v6651_v57  ;;  %v1976_v33 = vpop.permute.xlu1 %1975  ;;  %v7032_v28 = vrot.slane %v5520_v3, %v6651_v57  ;;  %v1034_v31 = vcombine.low %v6862_v17, %v994_v8  ;;  %v1035_v62 = vcombine.high %v6862_v17, %v994_v8  ;;  %5794 = vmatprep.mubr.msk.bf16.mxu0 %vm6313_vm0, %v6311_v4 }
 0x252   : > { %v1960_v25 = vpack.c.bf16 %v1944_v5, %v1944_v5  ;;  %v1351_v26 = vpack.c.bf16 %v1207_v11, %v1207_v11  ;;  %v1959_v29 = vpack.c.bf16 %v1815_v9, %v1815_v9  ;;  %v1338_v17 = vcombine.low %v7024_v16, %v7027_v21 }
 0x253   : > { %v1050_v18 = vcombine.low %v6865_v20, %v1001_v14  ;;  %v1051_v23 = vcombine.high %v6865_v20, %v1001_v14  ;;  %v1042_v10 = vrot.slane %v1034_v31, %v6656_v63  ;;  %v1049_v30 = vrot.slane %v1035_v62, %v6656_v63 }
 0x254   : > { %v2947_v32 = vsel %vm2574_vm1, %v1960_v25, 0  ;;  %v2901_v20 = vsel %vm2574_vm1, %v1959_v29, 0  ;;  %v7052_v41 = vrot.slane %v1881_v46, %v6656_v63  ;;  %v1913_v52 = vcombine.high %v6923_v36, %v6927_v22 }
 0x255   : > { %5793 = vmatpush3.bf16.xpose.msra.mxu0 %v2947_v32  ;;  %v1058_v39 = vrot.slane %v1050_v18, %v6656_v63  ;;  %v1065_v40 = vrot.slane %v1051_v23, %v6656_v63  ;;  %5777 = vmatmul.mubr.msk.bf16.vlgmr.msra.gmra.mxu1 %vm2574_vm1, %v1351_v26  ;;  %v5504_v51 = vcombine.low %v1042_v10, %v1049_v30  ;;  %v1982_v13 = vpop.permute.xlu1 %1981 }
 0x256   : > { %v5506_v59 = vcombine.high %v1042_v10, %v1049_v30  ;;  %5787 = vmatpush3.bf16.xpose.msra.mxu1 %v2901_v20  ;;  %5804 = vmatprep.subr.bf16.mxu0 %v6311_v4  ;;  %v2030_v50 = vcombine.low %v1970_v58, %v1976_v33  ;;  %v2031_v43 = vcombine.high %v1970_v58, %v1976_v33 }
 0x257   : > { %v5508_v34 = vcombine.low %v1058_v39, %v1065_v40  ;;  %v5510_v42 = vcombine.high %v1058_v39, %v1065_v40  ;;  %5788 = vmatprep.mubr.msk.bf16.mxu1 %vm6313_vm0, %v6311_v4  ;;  %v7060_v54 = vrot.slane %v5522_v61, %v6651_v57  ;;  %v1354_v47 = vpack.c.bf16 %v1338_v17, %v1338_v17  ;;  %v1988_v61 = vpop.permute.xlu0 %1987 }
 0x258   : > { %v1927_v15 = vrot.slane %v1913_v52, %v6656_v63  ;;  %v1209_v56 = vcombine.high %v6970_v60, %v6979_v49  ;;  %5798 = vmatprep.subr.bf16.mxu1 %v6311_v4  ;;  %v7067_v36 = vrot.slane %v5524_v55, %v6651_v57  ;;  %v7070_v22 = vrot.slane %v5526_v2, %v6651_v57 }
 0x259   : > { %v2038_v58 = vrot.slane %v2030_v50, %v6651_v57  ;;  %v2045_v3 = vrot.slane %v2031_v43, %v6651_v57  ;;  %v7075_v6 = vrot.slane %v5504_v51, %v6651_v57  ;;  %v7078_v7 = vrot.slane %v5506_v59, %v6651_v57 }
 0x25a   : > { %v7081_v60 = vrot.slane %v5508_v34, %v6651_v57  ;;  %v1946_v49 = vcombine.low %v7052_v41, %v1927_v15  ;;  %v7085_v55 = vrot.slane %v5510_v42, %v6651_v57  ;;  %v1353_v8 = vpack.c.bf16 %v1209_v56, %v1209_v56 }
 0x25b   : > { %v2078_v2 = vcombine.low %v6874_v45, %v2038_v58  ;;  %v2079_v5 = vcombine.high %v6874_v45, %v2038_v58  ;;  %v2094_v9 = vcombine.low %v6933_v24, %v2045_v3  ;;  %v2095_v14 = vcombine.high %v6933_v24, %v2045_v3  ;;  %v1985_v45 = vpop.permute.xlu1 %1984  ;;  %v7114_v32 = vpop.permute.xlu0 %1990 }
 0x25c   : > { %5795 = vmatmul.mubr.msk.bf16.vlgmr.msra.gmra.mxu0 %vm2574_vm1, %v1354_v47  ;;  %v1962_v11 = vpack.c.bf16 %v1946_v49, %v1946_v49  ;;  %v1945_v46 = vcombine.high %v7004_v0, %v7007_v1  ;;  %v2062_v31 = vcombine.low %v1982_v13, %v1988_v61  ;;  %v2063_v62 = vcombine.high %v1982_v13, %v1988_v61 }
 0x25d   : > { %v2086_v33 = vrot.slane %v2078_v2, %v6656_v63  ;;  %v2093_v25 = vrot.slane %v2079_v5, %v6656_v63  ;;  %5789 = vmatmul.mubr.msk.bf16.vlgmr.msra.gmra.mxu1 %vm2574_vm1, %v1353_v8  ;;  %v7099_v23 = vrot.slane %v2094_v9, %v6656_v63  ;;  %v7102_v26 = vrot.slane %v2095_v14, %v6656_v63 }
 0x25e   : > { %v3039_v18 = vsel %vm2574_vm1, %v1962_v11, 0  ;;  %v1961_v24 = vpack.c.bf16 %v1945_v46, %v1945_v46  ;;  %5806 = vmatprep.mubr.msk.bf16.mxu0 %vm6313_vm0, %v6311_v4  ;;  %5800 = vmatprep.mubr.msk.bf16.mxu1 %vm6313_vm0, %v6311_v4  ;;  %v1290_v0 = vcombine.low %v7075_v6, %v7078_v7  ;;  %v1291_v1 = vcombine.high %v7075_v6, %v7078_v7 }
 0x25f   : > { %v1322_v29 = vcombine.low %v7081_v60, %v7085_v55  ;;  %5805 = vmatpush3.bf16.xpose.msra.mxu0 %v3039_v18  ;;  %v1323_v10 = vcombine.high %v7081_v60, %v7085_v55  ;;  %v5527_v30 = vcombine.low %v2086_v33, %v2093_v25  ;;  %v7123_v39 = vrot.slane %v1275_v44, %v6656_v63  ;;  %v1994_v42 = vpop.permute.xlu1 %1993  ;;  %v2000_v61 = vpop.permute.xlu0 %1999 }
 0x260   : > { %v2993_v17 = vsel %vm2574_vm1, %v1961_v24, 0  ;;  %5816 = vmatprep.subr.bf16.mxu0 %v6311_v4  ;;  %v5529_v40 = vcombine.high %v2086_v33, %v2093_v25  ;;  %v2070_v20 = vrot.slane %v2062_v31, %v6651_v57  ;;  %v7131_v51 = vrot.slane %v1307_v48, %v6656_v63 }
 0x261   : > { %5799 = vmatpush3.bf16.xpose.msra.mxu1 %v2993_v17  ;;  %v1896_v59 = vcombine.low %v7032_v28, %v7060_v54  ;;  %v5531_v12 = vcombine.low %v7099_v23, %v7102_v26  ;;  %v2077_v19 = vrot.slane %v2063_v62, %v6651_v57  ;;  %v1928_v44 = vcombine.low %v7067_v36, %v7070_v22 }
 0x262   : > { %v2046_v52 = vcombine.low %v7040_v35, %v1985_v45  ;;  %5810 = vmatprep.subr.bf16.mxu1 %v6311_v4  ;;  %v1340_v27 = vcombine.low %v7123_v39, %v7131_v51  ;;  %v2047_v48 = vcombine.high %v7040_v35, %v1985_v45  ;;  %v1339_v34 = vcombine.high %v7024_v16, %v7027_v21 }
 0x263   : > { %v1904_v37 = vrot.slane %v1896_v59, %v6656_v63  ;;  %v5533_v50 = vcombine.high %v7099_v23, %v7102_v26  ;;  %v1936_v43 = vrot.slane %v1928_v44, %v6656_v63  ;;  %v1947_v47 = vcombine.high %v7052_v41, %v1927_v15  ;;  %v1997_v45 = vpop.permute.xlu1 %1996 }
 0x264   : > { %v2054_v13 = vrot.slane %v2046_v52, %v6651_v57  ;;  %v7154_v56 = vrot.slane %v5527_v30, %v6651_v57  ;;  %v1356_v58 = vpack.c.bf16 %v1340_v27, %v1340_v27  ;;  %v2061_v3 = vrot.slane %v2047_v48, %v6651_v57 }
 0x265   : > { %v1355_v35 = vpack.c.bf16 %v1339_v34, %v1339_v34  ;;  %v1948_v49 = vcombine.low %v1904_v37, %v1936_v43  ;;  %v1963_v2 = vpack.c.bf16 %v1947_v47, %v1947_v47  ;;  %v7158_v5 = vrot.slane %v5529_v40, %v6651_v57 }
 0x266   : > { %v2110_v16 = vcombine.low %v2054_v13, %v2070_v20  ;;  %v2111_v21 = vcombine.high %v2054_v13, %v2070_v20  ;;  %5807 = vmatmul.mubr.msk.bf16.vlgmr.msra.gmra.mxu0 %vm2574_vm1, %v1356_v58  ;;  %v2126_v8 = vcombine.low %v2061_v3, %v2077_v19  ;;  %v2127_v11 = vcombine.high %v2061_v3, %v2077_v19 }
 0x267   : > { %v2166_v41 = vcombine.low %v1994_v42, %v2000_v61  ;;  %v1964_v15 = vpack.c.bf16 %v1948_v49, %v1948_v49  ;;  %v3085_v46 = vsel %vm2574_vm1, %v1963_v2, 0  ;;  %5818 = vmatprep.mubr.msk.bf16.mxu0 %vm6313_vm0, %v6311_v4  ;;  %v1298_v31 = vrot.slane %v1290_v0, %v6656_v63 }
 0x268   : > { %v7162_v9 = vrot.slane %v2110_v16, %v6656_v63  ;;  %v7165_v14 = vrot.slane %v2111_v21, %v6656_v63  ;;  %5801 = vmatmul.mubr.msk.bf16.vlgmr.msra.gmra.mxu1 %vm2574_vm1, %v1355_v35  ;;  %v7172_v33 = vrot.slane %v2126_v8, %v6656_v63  ;;  %v7175_v25 = vrot.slane %v2127_v11, %v6656_v63 }
 0x269   : > { %5811 = vmatpush3.bf16.xpose.msra.mxu1 %v3085_v46  ;;  %v1330_v62 = vrot.slane %v1322_v29, %v6656_v63  ;;  %v3131_v18 = vsel %vm2574_vm1, %v1964_v15, 0  ;;  %v1897_v24 = vcombine.high %v7032_v28, %v7060_v54  ;;  %5812 = vmatprep.mubr.msk.bf16.mxu1 %vm6313_vm0, %v6311_v4  ;;  %v1929_v17 = vcombine.high %v7067_v36, %v7070_v22 }
 0x26a   : > { %v5528_v23 = vcombine.low %v7162_v9, %v7165_v14  ;;  %v5530_v26 = vcombine.high %v7162_v9, %v7165_v14  ;;  %5822 = vmatprep.subr.bf16.mxu1 %v6311_v4  ;;  %5817 = vmatpush3.bf16.xpose.msra.mxu0 %v3131_v18  ;;  %v5532_v0 = vcombine.low %v7172_v33, %v7175_v25 }
 0x26b   : > { %v5534_v29 = vcombine.high %v7172_v33, %v7175_v25  ;;  %v1342_v30 = vcombine.low %v1298_v31, %v1330_v62  ;;  %v7196_v40 = vrot.slane %v5531_v12, %v6651_v57  ;;  %v2167_v28 = vcombine.high %v1994_v42, %v2000_v61  ;;  %5828 = vmatprep.subr.bf16.mxu0 %v6311_v4 }
 0x26c   : > { %v1911_v54 = vrot.slane %v1897_v24, %v6656_v63  ;;  %v2150_v20 = vcombine.low %v7114_v32, %v1997_v45  ;;  %v7202_v59 = vrot.slane %v5533_v50, %v6651_v57  ;;  %v2174_v19 = vrot.slane %v2166_v41, %v6651_v57 }
 0x26d   : > { %v1358_v44 = vpack.c.bf16 %v1342_v30, %v1342_v30  ;;  %v1943_v52 = vrot.slane %v1929_v17, %v6656_v63  ;;  %v2151_v36 = vcombine.high %v7114_v32, %v1997_v45  ;;  %v1341_v12 = vcombine.high %v7123_v39, %v7131_v51 }
 0x26e   : > { %v2158_v22 = vrot.slane %v2150_v20, %v6651_v57  ;;  %v1949_v27 = vcombine.high %v1904_v37, %v1936_v43  ;;  %v1305_v34 = vrot.slane %v1291_v1, %v6656_v63  ;;  %v1337_v42 = vrot.slane %v1323_v10, %v6656_v63 }
 0x26f   : > { %v1950_v48 = vcombine.low %v1911_v54, %v1943_v52  ;;  %v2350_v32 = vcombine.low %v7154_v56, %v7158_v5  ;;  %v2181_v50 = vrot.slane %v2167_v28, %v6651_v57  ;;  %v2165_v13 = vrot.slane %v2151_v36, %v6651_v57 }
 0x270   : > { %v2214_v39 = vcombine.low %v2158_v22, %v2174_v19  ;;  %v2215_v51 = vcombine.high %v2158_v22, %v2174_v19  ;;  %v1357_v43 = vpack.c.bf16 %v1341_v12, %v1341_v12  ;;  %v1965_v47 = vpack.c.bf16 %v1949_v27, %v1949_v27 }
 0x271   : > { %v1966_v37 = vpack.c.bf16 %v1950_v48, %v1950_v48  ;;  %v1344_v58 = vcombine.low %v1305_v34, %v1337_v42  ;;  %5819 = vmatmul.mubr.msk.bf16.vlgmr.msra.gmra.mxu0 %vm2574_vm1, %v1358_v44  ;;  %v2230_v60 = vcombine.low %v2165_v13, %v2181_v50  ;;  %v2231_v55 = vcombine.high %v2165_v13, %v2181_v50 }
 0x272   : > { %v2222_v6 = vrot.slane %v2214_v39, %v6656_v63  ;;  %v2229_v7 = vrot.slane %v2215_v51, %v6656_v63  ;;  %5813 = vmatmul.mubr.msk.bf16.vlgmr.msra.gmra.mxu1 %vm2574_vm1, %v1357_v43  ;;  %v3177_v10 = vsel %vm2574_vm1, %v1965_v47, 0  ;;  %5830 = vmatprep.mubr.msk.bf16.mxu0 %vm6313_vm0, %v6311_v4  ;;  %v2358_v3 = vrot.slane %v2350_v32, %v6656_v63 }
 0x273   : > { %v3223_v1 = vsel %vm2574_vm1, %v1966_v37, 0  ;;  %v2382_v35 = vcombine.low %v7196_v40, %v7202_v59  ;;  %v2238_v61 = vrot.slane %v2230_v60, %v6656_v63  ;;  %v2245_v49 = vrot.slane %v2231_v55, %v6656_v63  ;;  %5823 = vmatpush3.bf16.xpose.msra.mxu1 %v3177_v10  ;;  %5824 = vmatprep.mubr.msk.bf16.mxu1 %vm6313_vm0, %v6311_v4 }
 0x274   : > { %5829 = vmatpush3.bf16.xpose.msra.mxu0 %v3223_v1  ;;  %v5535_v16 = vcombine.low %v2222_v6, %v2229_v7  ;;  %v5537_v21 = vcombine.high %v2222_v6, %v2229_v7  ;;  %v1343_v8 = vcombine.high %v1298_v31, %v1330_v62  ;;  %v1951_v11 = vcombine.high %v1911_v54, %v1943_v52 }
 0x275   : > { %5840 = vmatprep.subr.bf16.mxu0 %v6311_v4  ;;  %v2390_v2 = vrot.slane %v2382_v35, %v6656_v63  ;;  %v2301_v41 = vrot.slane %v5528_v23, %v6651_v57  ;;  %v2317_v15 = vrot.slane %v5530_v26, %v6651_v57  ;;  %v5539_v9 = vcombine.low %v2238_v61, %v2245_v49 }
 0x276   : > { %v5541_v14 = vcombine.high %v2238_v61, %v2245_v49  ;;  %v2333_v46 = vrot.slane %v5532_v0, %v6651_v57  ;;  %v2349_v33 = vrot.slane %v5534_v29, %v6651_v57  ;;  %v1360_v25 = vpack.c.bf16 %v1344_v58, %v1344_v58  ;;  %5834 = vmatprep.subr.bf16.mxu1 %v6311_v4  ;;  %v7302_v61 = vld [vmem:[%s7928_s27] sm:$0x1] }
 0x277   : > { %v2414_v45 = vcombine.low %v2358_v3, %v2390_v2  ;;  %v2430_v31 = vrot.slane %v5535_v16, %v6651_v57  ;;  %v2446_v62 = vrot.slane %v5537_v21, %v6651_v57  ;;  %v1967_v18 = vpack.c.bf16 %v1951_v11, %v1951_v11 }
 0x278   : > { %v2415_v23 = vcombine.high %v2358_v3, %v2390_v2  ;;  %v2462_v26 = vrot.slane %v5539_v9, %v6651_v57  ;;  %v1359_v30 = vpack.c.bf16 %v1343_v8, %v1343_v8  ;;  %v1345_v17 = vcombine.high %v1305_v34, %v1337_v42  ;;  %v3311_v2 = vld [vmem:[%s7882_s2] sm:$0xff] }
 0x279   : > { %v2558_v24 = vpack.c.bf16 %v2414_v45, %v2414_v45  ;;  %v2478_v28 = vrot.slane %v5541_v14, %v6651_v57  ;;  %v2351_v0 = vcombine.high %v7154_v56, %v7158_v5  ;;  %v2383_v29 = vcombine.high %v7196_v40, %v7202_v59 }
 0x27a   : > { %v2366_v54 = vcombine.low %v2301_v41, %v2317_v15  ;;  %v2559_v19 = vpack.c.bf16 %v2415_v23, %v2415_v23  ;;  %v2398_v44 = vcombine.low %v2333_v46, %v2349_v33  ;;  %v2367_v52 = vcombine.high %v2301_v41, %v2317_v15  ;;  %5825 = vmatmul.mubr.msk.bf16.vlgmr.msra.gmra.mxu1 %vm2574_vm1, %v1359_v30  ;;  %v3315_v30 = vld [vmem:[%s7882_s2 + $0x20] sm:$0xff] }
 0x27b   : > { %5831 = vmatmul.mubr.msk.bf16.vlgmr.msra.gmra.mxu0 %vm2574_vm1, %v1360_v25  ;;  %v3562_v20 = vsel %vm3560_vm2, %v2558_v24, 0  ;;  %v3269_v36 = vsel %vm2574_vm1, %v1967_v18, 0  ;;  %v2365_v22 = vrot.slane %v2351_v0, %v6656_v63  ;;  %v2397_v56 = vrot.slane %v2383_v29, %v6656_v63  ;;  %5836 = vmatprep.mubr.msk.bf16.mxu1 %vm6313_vm0, %v6311_v4  ;;  %v3313_v18 = vld [vmem:[%s7882_s2 + $0x10] sm:$0xff] }
 0x27c   : > { %5841 = vmatpush3.bf16.msra.mxu0 %v3562_v20  ;;  %v2374_v5 = vrot.slane %v2366_v54, %v6656_v63  ;;  %5835 = vmatpush3.bf16.xpose.msra.mxu1 %v3269_v36  ;;  %v2406_v40 = vrot.slane %v2398_v44, %v6656_v63  ;;  %v2381_v59 = vrot.slane %v2367_v52, %v6656_v63  ;;  %v3608_v6 = vsel %vm3560_vm2, %v2559_v19, 0  ;;  %v3314_v36 = vld [vmem:[%s7882_s2 + $0x18] sm:$0xff] }
 0x27d   : > { %v2399_v12 = vcombine.high %v2333_v46, %v2349_v33  ;;  %5846 = vmatprep.subr.bf16.mxu1 %v6311_v4  ;;  %5842 = vmatprep.mubr.msk.bf16.mxu0 %vm6313_vm0, %v6311_v4  ;;  %v7266_v27 = vcombine.low %v2365_v22, %v2397_v56  ;;  %v7268_v48 = vcombine.high %v2365_v22, %v2397_v56  ;;  %v496_v49 = vsub.f32 1.0, %v7302_v61 }
 0x27e   : > { %v2486_v34 = vcombine.low %v2430_v31, %v2446_v62  ;;  %5852 = vmatprep.subr.bf16.mxu0 %v6311_v4  ;;  %v7271_v42 = vcombine.low %v2374_v5, %v2406_v40  ;;  %v7273_v32 = vcombine.high %v2374_v5, %v2406_v40  ;;  %v2518_v13 = vcombine.low %v2462_v26, %v2478_v28 }
 0x27f   : > { %v2413_v50 = vrot.slane %v2399_v12, %v6656_v63  ;;  %v2487_v51 = vcombine.high %v2430_v31, %v2446_v62  ;;  %v1361_v47 = vpack.c.bf16 %v1345_v17, %v1345_v17  ;;  %v2519_v1 = vcombine.high %v2462_v26, %v2478_v28  ;;  %v3312_v26 = vld [vmem:[%s7882_s2 + $0x8] sm:$0xff] }
 0x280   : > { %v2494_v39 = vrot.slane %v2486_v34, %v6656_v63  ;;  %v2526_v58 = vrot.slane %v2518_v13, %v6656_v63  ;;  %v497_v16 = vmul.f32 -1e+09, %v496_v49  ;;  %v3346_v21 = vsub.s32 0, %v6646_v53  ;;  %v3316_v49 = vld [vmem:[%s7882_s2 + $0x28] sm:$0xff] }
 0x281   : > { %v7277_v37 = vcombine.low %v2381_v59, %v2413_v50  ;;  %v7279_v43 = vcombine.high %v2381_v59, %v2413_v50  ;;  %v2501_v55 = vrot.slane %v2487_v51, %v6656_v63  ;;  %v2533_v10 = vrot.slane %v2519_v1, %v6656_v63 }
 0x282   : > { %v7284_v7 = vcombine.low %v2494_v39, %v2526_v58  ;;  %v7286_v60 = vcombine.high %v2494_v39, %v2526_v58  ;;  %v7311_v8 = vrot.slane %v497_v16, %v3346_v21 }
 0x283   : > { %5837 = vmatmul.mubr.msk.bf16.vlgmr.msra.gmra.mxu1 %vm2574_vm1, %v1361_v47  ;;  %v7293_v3 = vcombine.low %v2501_v55, %v2533_v10  ;;  %v7295_v35 = vcombine.high %v2501_v55, %v2533_v10  ;;  %v3317_v47 = vld [vmem:[%s7882_s2 + $0x30] sm:$0xff] }
 0x284   : > { %5847 = vmatpush3.bf16.msra.mxu1 %v3608_v6  ;;  %5848 = vmatprep.mubr.msk.bf16.mxu1 %vm6313_vm0, %v6311_v4 }
 0x285   : > { %5858 = vmatprep.subr.bf16.mxu1 %v6311_v4 }
 0x2eb   : > { %v2615_v11 = vpop.f32.mrf.mxu1 }
 0x2ec   : > { %v3327_v41 = vadd.f32 %v3311_v2, %v2615_v11 }
 0x2ed   : > { %v5748_v15 = vpop.f32.mrf.mxu1 }
 0x2ee   : > { %v7314_v9 = vadd.f32 %v7311_v8, %v3327_v41 }
 0x2ef   : > { %v2618_v14 = vpop.f32.mrf.mxu1 }
 0x2f0   : > { %v3365_v46 = vsel %vm2574_vm1, %v7314_v9, -inf }
 0x2f1   : > { %v5749_v33 = vpop.f32.mrf.mxu1  ;;  %3366 = vmax.xlane.f32.xlu0 %v3365_v46 }
 0x2f3   : > { %v2661_v25 = vpop.f32.mrf.mxu1 }
 0x2f4   : > { %v3328_v29 = vadd.f32 %v3312_v26, %v2661_v25 }
 0x2f5   : > { %v5754_v45 = vpop.f32.mrf.mxu1 }
 0x2f6   : > { %v7341_v59 = vadd.f32 %v7311_v8, %v3328_v29  ;;  %v3319_v45 = vld [vmem:[%s7882_s2 + $0x40] sm:$0xff] }
 0x2f7   : > { %v2664_v31 = vpop.f32.mrf.mxu1 }
 0x2f8   : > { %v3368_v51 = vsel %vm2574_vm1, %v7341_v59, -inf }
 0x2f9   : > { %v5755_v62 = vpop.f32.mrf.mxu1 }
 0x301   : > { %v2707_v23 = vpop.f32.mrf.mxu1 }
 0x302   : > { %v3329_v24 = vadd.f32 %v3313_v18, %v2707_v23  ;;  %v3318_v18 = vld [vmem:[%s7882_s2 + $0x38] sm:$0xff] }
 0x303   : > { %v5760_v17 = vpop.f32.mrf.mxu1 }
 0x304   : > { %v2799_v28 = vpop.f32.mrf.mxu0  ;;  %v7328_v0 = vadd.f32 %v7311_v8, %v3329_v24 }
 0x305   : > { %v2710_v54 = vpop.f32.mrf.mxu1  ;;  %v3331_v20 = vadd.f32 %v3315_v30, %v2799_v28 }
 0x306   : > { %v5772_v19 = vpop.f32.mrf.mxu0  ;;  %v3371_v44 = vsel %vm2574_vm1, %v7328_v0, -inf }
 0x307   : > { %v5761_v52 = vpop.f32.mrf.mxu1  ;;  %3372 = vmax.xlane.f32.xlu0 %v3371_v44  ;;  %v7336_v22 = vadd.f32 %v7311_v8, %v3331_v20 }
 0x308   : > { %v2802_v56 = vpop.f32.mrf.mxu0 }
 0x309   : > { %v2753_v5 = vpop.f32.mrf.mxu1  ;;  %v3377_v40 = vsel %vm2574_vm1, %v7336_v22, -inf }
 0x30a   : > { %v3330_v12 = vadd.f32 %v3314_v36, %v2753_v5  ;;  %v5773_v34 = vpop.f32.mrf.mxu0  ;;  %3378 = vmax.xlane.f32.xlu1 %v3377_v40  ;;  %v3321_v5 = vld [vmem:[%s7882_s2 + $0x50] sm:$0xff]  ;;  %v3320_v40 = vld [vmem:[%s7882_s2 + $0x48] sm:$0xff] }
 0x30b   : > { %v5766_v50 = vpop.f32.mrf.mxu1 }
 0x30c   : > { %v7344_v13 = vadd.f32 %v7311_v8, %v3330_v12 }
 0x30d   : > { %v2756_v39 = vpop.f32.mrf.mxu1 }
 0x30e   : > { %3369 = vmax.xlane.f32.xlu1 %v3368_v51  ;;  %v3374_v58 = vsel %vm2574_vm1, %v7344_v13, -inf }
 0x30f   : > { %v5767_v6 = vpop.f32.mrf.mxu1  ;;  %3375 = vmax.xlane.f32.xlu0 %v3374_v58 }
 0x310   : > { %v2891_v55 = vpop.f32.mrf.mxu0 }
 0x311   : > { %v3333_v1 = vadd.f32 %v3317_v47, %v2891_v55 }
 0x312   : > { %v5784_v10 = vpop.f32.mrf.mxu0 }
 0x313   : > { %v7357_v16 = vadd.f32 %v7311_v8, %v3333_v1 }
 0x314   : > { %v2894_v11 = vpop.f32.mrf.mxu0 }
 0x315   : > { %v2845_v2 = vpop.f32.mrf.mxu1  ;;  %v3383_v15 = vsel %vm2574_vm1, %v7357_v16, -inf }
 0x316   : > { %v3332_v41 = vadd.f32 %v3316_v49, %v2845_v2  ;;  %v5785_v46 = vpop.f32.mrf.mxu0  ;;  %3384 = vmax.xlane.f32.xlu1 %v3383_v15  ;;  %v3322_v15 = vld [vmem:[%s7882_s2 + $0x58] sm:$0xff] }
 0x317   : > { %v5778_v14 = vpop.f32.mrf.mxu1 }
 0x318   : > { %v7362_v33 = vadd.f32 %v7311_v8, %v3332_v41  ;;  %v3323_v41 = vld [vmem:[%s7882_s2 + $0x60] sm:$0xff] }
 0x319   : > { %v2848_v25 = vpop.f32.mrf.mxu1 }
 0x31a   : > { %v3380_v31 = vsel %vm2574_vm1, %v7362_v33, -inf }
 0x31b   : > { %v5779_v62 = vpop.f32.mrf.mxu1  ;;  %3381 = vmax.xlane.f32.xlu0 %v3380_v31 }
 0x31c   : > { %v2983_v23 = vpop.f32.mrf.mxu0 }
 0x31d   : > { %v3335_v26 = vadd.f32 %v3319_v45, %v2983_v23  ;;  %v2937_v24 = vpop.f32.mrf.mxu1 }
 0x31e   : > { %v5796_v30 = vpop.f32.mrf.mxu0  ;;  %v3334_v17 = vadd.f32 %v3318_v18, %v2937_v24 }
 0x31f   : > { %v5790_v28 = vpop.f32.mrf.mxu1  ;;  %v7373_v29 = vadd.f32 %v7311_v8, %v3335_v26 }
 0x320   : > { %v2986_v54 = vpop.f32.mrf.mxu0  ;;  %v7376_v20 = vadd.f32 %v7311_v8, %v3334_v17 }
 0x321   : > { %v3389_v19 = vsel %vm2574_vm1, %v7373_v29, -inf  ;;  %v2940_v44 = vpop.f32.mrf.mxu1  ;;  %v3325_v54 = vld [vmem:[%s7882_s2 + $0x70] sm:$0xff] }
 0x322   : > { %v5797_v52 = vpop.f32.mrf.mxu0  ;;  %3390 = vmax.xlane.f32.xlu1 %v3389_v19  ;;  %v3386_v36 = vsel %vm2574_vm1, %v7376_v20, -inf  ;;  %v3324_v44 = vld [vmem:[%s7882_s2 + $0x68] sm:$0xff] }
 0x323   : > { %v5791_v56 = vpop.f32.mrf.mxu1  ;;  %3387 = vmax.xlane.f32.xlu0 %v3386_v36 }
 0x326   : > { %v3075_v12 = vpop.f32.mrf.mxu0 }
 0x327   : > { %v3337_v34 = vadd.f32 %v3321_v5, %v3075_v12 }
 0x328   : > { %v3029_v50 = vpop.f32.mrf.mxu1  ;;  %v5808_v39 = vpop.f32.mrf.mxu0 }
 0x329   : > { %v3336_v51 = vadd.f32 %v3320_v40, %v3029_v50  ;;  %v7389_v58 = vadd.f32 %v7311_v8, %v3337_v34 }
 0x32a   : > { %v5802_v47 = vpop.f32.mrf.mxu1  ;;  %v3078_v6 = vpop.f32.mrf.mxu0 }
 0x32b   : > { %v7392_v55 = vadd.f32 %v7311_v8, %v3336_v51  ;;  %v3395_v1 = vsel %vm2574_vm1, %v7389_v58, -inf }
 0x32c   : > { %v3032_v10 = vpop.f32.mrf.mxu1  ;;  %v5809_v49 = vpop.f32.mrf.mxu0  ;;  %3396 = vmax.xlane.f32.xlu1 %v3395_v1 }
 0x32d   : > { %v3392_v2 = vsel %vm2574_vm1, %v7392_v55, -inf  ;;  %v3326_v49 = vld [vmem:[%s7882_s2 + $0x78] sm:$0xff] }
 0x32e   : > { %v5803_v11 = vpop.f32.mrf.mxu1  ;;  %3393 = vmax.xlane.f32.xlu0 %v3392_v2 }
 0x331   : > { %v3167_v14 = vpop.f32.mrf.mxu0 }
 0x332   : > { %v3339_v46 = vadd.f32 %v3323_v41, %v3167_v14  ;;  %v3121_v25 = vpop.f32.mrf.mxu1 }
 0x333   : > { %v5820_v45 = vpop.f32.mrf.mxu0  ;;  %v3338_v31 = vadd.f32 %v3322_v15, %v3121_v25 }
 0x334   : > { %v5814_v62 = vpop.f32.mrf.mxu1  ;;  %v7405_v18 = vadd.f32 %v7311_v8, %v3339_v46 }
 0x335   : > { %v3170_v23 = vpop.f32.mrf.mxu0  ;;  %v7408_v26 = vadd.f32 %v7311_v8, %v3338_v31 }
 0x336   : > { %v3401_v24 = vsel %vm2574_vm1, %v7405_v18, -inf  ;;  %v3124_v30 = vpop.f32.mrf.mxu1 }
 0x337   : > { %v5821_v17 = vpop.f32.mrf.mxu0  ;;  %3402 = vmax.xlane.f32.xlu1 %v3401_v24  ;;  %v3398_v28 = vsel %vm2574_vm1, %v7408_v26, -inf }
 0x338   : > { %v5815_v19 = vpop.f32.mrf.mxu1  ;;  %3399 = vmax.xlane.f32.xlu0 %v3398_v28 }
 0x33a   : > { %v3213_v56 = vpop.f32.mrf.mxu1 }
 0x33b   : > { %v3259_v52 = vpop.f32.mrf.mxu0  ;;  %v3340_v40 = vadd.f32 %v3324_v44, %v3213_v56 }
 0x33c   : > { %v3341_v36 = vadd.f32 %v3325_v54, %v3259_v52  ;;  %v5826_v12 = vpop.f32.mrf.mxu1 }
 0x33d   : > { %v5832_v5 = vpop.f32.mrf.mxu0  ;;  %v7424_v39 = vadd.f32 %v7311_v8, %v3340_v40 }
 0x33e   : > { %v7421_v34 = vadd.f32 %v7311_v8, %v3341_v36  ;;  %v3216_v47 = vpop.f32.mrf.mxu1 }
 0x33f   : > { %v3262_v50 = vpop.f32.mrf.mxu0  ;;  %v3404_v1 = vsel %vm2574_vm1, %v7424_v39, -inf }
 0x340   : > { %v3407_v51 = vsel %vm2574_vm1, %v7421_v34, -inf  ;;  %v5827_v10 = vpop.f32.mrf.mxu1  ;;  %3405 = vmax.xlane.f32.xlu0 %v3404_v1 }
 0x341   : > { %v5833_v6 = vpop.f32.mrf.mxu0  ;;  %3408 = vmax.xlane.f32.xlu1 %v3407_v51 }
 0x343   : > { %v3305_v2 = vpop.f32.mrf.mxu1 }
 0x344   : > { %v3342_v11 = vadd.f32 %v3326_v49, %v3305_v2 }
 0x345   : > { %v5838_v41 = vpop.f32.mrf.mxu1 }
 0x346   : > { %v7434_v15 = vadd.f32 %v7311_v8, %v3342_v11 }
 0x347   : > { %v3308_v14 = vpop.f32.mrf.mxu1 }
 0x348   : > { %v3410_v46 = vsel %vm2574_vm1, %v7434_v15, -inf }
 0x349   : > { %v5839_v25 = vpop.f32.mrf.mxu1  ;;  %3411 = vmax.xlane.f32.xlu0 %v3410_v46 }
 0x352   : > { %2005 = vrot.lane.b32.xlu1 %v6560_v38, %s6327_s22 }
 0x35f   : > { %2002 = vrot.lane.b32.xlu0 %v6560_v38, %s6323_s20 }
 0x37a   : > { %v3367_v45 = vpop.xlane.xlu0 %3366 }
 0x37b   : > { %v3413_v31 = vsub.f32 %v7314_v9, %v3367_v45 }
 0x37d   : > { %v3429_v62 = vmul.f32 1.442695, %v3413_v31 }
 0x37f   : > { %6146 = vpow2.f32 %v3429_v62 }
 0x38c   : > { %v7443_v23 = vpop.eup %6146 }
 0x38d   : > { %v3461_v8 = vsel %vm2574_vm1, %v7443_v23, 0.0 }
 0x38e   : > { %3462 = vadd.xlane.f32.xlu1 %v3461_v8 }
 0x390   : > { %v3373_v44 = vpop.xlane.xlu0 %3372 }
 0x391   : > { %v3415_v9 = vsub.f32 %v7328_v0, %v3373_v44 }
 0x393   : > { %v3379_v24 = vpop.xlane.xlu1 %3378  ;;  %v3433_v56 = vmul.f32 1.442695, %v3415_v9 }
 0x394   : > { %v3417_v30 = vsub.f32 %v7336_v22, %v3379_v24 }
 0x396   : > { %v3437_v17 = vmul.f32 1.442695, %v3417_v30 }
 0x397   : > { %v3370_v28 = vpop.xlane.xlu1 %3369 }
 0x398   : > { %6148 = vpow2.f32 %v3437_v17  ;;  %v3414_v54 = vsub.f32 %v7341_v59, %v3370_v28  ;;  %v3376_v22 = vpop.xlane.xlu0 %3375 }
 0x399   : > { %v3416_v50 = vsub.f32 %v7344_v13, %v3376_v22 }
 0x39a   : > { %v3431_v19 = vmul.f32 1.442695, %v3414_v54 }
 0x39b   : > { %v3435_v47 = vmul.f32 1.442695, %v3416_v50 }
 0x39c   : > { %6150 = vpow2.f32 %v3431_v19 }
 0x39f   : > { %v3385_v52 = vpop.xlane.xlu1 %3384 }
 0x3a0   : > { %v3419_v36 = vsub.f32 %v7357_v16, %v3385_v52 }
 0x3a2   : > { %v3441_v5 = vmul.f32 1.442695, %v3419_v36 }
 0x3a4   : > { %6152 = vpow2.f32 %v3441_v5  ;;  %v3382_v1 = vpop.xlane.xlu0 %3381 }
 0x3a5   : > { %v7451_v40 = vpop.eup %6148  ;;  %6154 = vpow2.f32 %v3433_v56  ;;  %v3418_v13 = vsub.f32 %v7362_v33, %v3382_v1 }
 0x3a6   : > { %v3473_v12 = vsel %vm2574_vm1, %v7451_v40, 0.0 }
 0x3a7   : > { %3474 = vadd.xlane.f32.xlu0 %v3473_v12  ;;  %v3439_v25 = vmul.f32 1.442695, %v3418_v13 }
 0x3a9   : > { %v7455_v59 = vpop.eup %6150 }
 0x3aa   : > { %v3464_v0 = vsel %vm2574_vm1, %v7455_v59, 0.0 }
 0x3ab   : > { %v3391_v51 = vpop.xlane.xlu1 %3390  ;;  %3465 = vadd.xlane.f32.xlu0 %v3464_v0 }
 0x3ac   : > { %v3421_v16 = vsub.f32 %v7373_v29, %v3391_v51  ;;  %v3388_v49 = vpop.xlane.xlu0 %3387 }
 0x3ae   : > { %v3445_v6 = vmul.f32 1.442695, %v3421_v16 }
 0x3b0   : > { %6156 = vpow2.f32 %v3445_v6 }
 0x3b1   : > { %v7461_v10 = vpop.eup %6152  ;;  %6158 = vpow2.f32 %v3435_v47 }
 0x3b2   : > { %v3479_v2 = vsel %vm2574_vm1, %v7461_v10, 0.0  ;;  %v7465_v11 = vpop.eup %6154 }
 0x3b3   : > { %3480 = vadd.xlane.f32.xlu1 %v3479_v2  ;;  %v3467_v46 = vsel %vm2574_vm1, %v7465_v11, 0.0 }
 0x3b5   : > { %v3397_v41 = vpop.xlane.xlu1 %3396 }
 0x3b6   : > { %v3423_v29 = vsub.f32 %v7389_v58, %v3397_v41  ;;  %v3420_v58 = vsub.f32 %v7376_v20, %v3388_v49 }
 0x3b7   : > { %v3394_v14 = vpop.xlane.xlu0 %3393  ;;  %3468 = vadd.xlane.f32.xlu1 %v3467_v46 }
 0x3b8   : > { %v3449_v45 = vmul.f32 1.442695, %v3423_v29  ;;  %v3422_v31 = vsub.f32 %v7392_v55, %v3394_v14  ;;  %v3443_v54 = vmul.f32 1.442695, %v3420_v58 }
 0x3ba   : > { %6160 = vpow2.f32 %v3449_v45  ;;  %v3447_v8 = vmul.f32 1.442695, %v3422_v31 }
 0x3bb   : > { %6162 = vpow2.f32 %v3439_v25 }
 0x3bc   : > { %6164 = vpow2.f32 %v3447_v8 }
 0x3bd   : > { %v7472_v62 = vpop.eup %6156 }
 0x3be   : > { %v3485_v33 = vsel %vm2574_vm1, %v7472_v62, 0.0  ;;  %v7476_v24 = vpop.eup %6158 }
 0x3bf   : > { %3486 = vadd.xlane.f32.xlu0 %v3485_v33  ;;  %v3470_v55 = vsel %vm2574_vm1, %v7476_v24, 0.0  ;;  %v2560_v33 = vpack.c.bf16 %v7266_v27, %v7266_v27 }
 0x3c0   : > { %v3403_v30 = vpop.xlane.xlu1 %3402 }
 0x3c1   : > { %v3425_v17 = vsub.f32 %v7405_v18, %v3403_v30  ;;  %v3400_v28 = vpop.xlane.xlu0 %3399  ;;  %v3654_v30 = vsel %vm3560_vm2, %v2560_v33, 0 }
 0x3c2   : > { %v3424_v44 = vsub.f32 %v7408_v26, %v3400_v28 }
 0x3c3   : > { %3471 = vadd.xlane.f32.xlu0 %v3470_v55  ;;  %v3453_v19 = vmul.f32 1.442695, %v3425_v17 }
 0x3c4   : > { %v3451_v52 = vmul.f32 1.442695, %v3424_v44  ;;  %v2561_v44 = vpack.c.bf16 %v7268_v48, %v7268_v48  ;;  %v2562_v48 = vpack.c.bf16 %v7271_v42, %v7271_v42  ;;  %v2564_v42 = vpack.c.bf16 %v7277_v37, %v7277_v37 }
 0x3c5   : > { %6166 = vpow2.f32 %v3453_v19 }
 0x3c6   : > { %6168 = vpow2.f32 %v3443_v54 }
 0x3c7   : > { %v7483_v9 = vpop.eup %6160  ;;  %6170 = vpow2.f32 %v3451_v52 }
 0x3c8   : > { %v3491_v20 = vsel %vm2574_vm1, %v7483_v9, 0.0  ;;  %v7487_v36 = vpop.eup %6162 }
 0x3c9   : > { %3492 = vadd.xlane.f32.xlu1 %v3491_v20  ;;  %v3406_v18 = vpop.xlane.xlu0 %3405  ;;  %v3476_v5 = vsel %vm2574_vm1, %v7487_v36, 0.0  ;;  %v7492_v22 = vpop.eup %6164 }
 0x3ca   : > { %v3426_v56 = vsub.f32 %v7424_v39, %v3406_v18  ;;  %v3488_v12 = vsel %vm2574_vm1, %v7492_v22, 0.0  ;;  %v3409_v2 = vpop.xlane.xlu1 %3408  ;;  %v3700_v18 = vsel %vm3560_vm2, %v2561_v44, 0 }
 0x3cb   : > { %v3427_v41 = vsub.f32 %v7421_v34, %v3409_v2 }
 0x3cc   : > { %v3455_v26 = vmul.f32 1.442695, %v3426_v56 }
 0x3cd   : > { %3477 = vadd.xlane.f32.xlu1 %v3476_v5  ;;  %v3457_v14 = vmul.f32 1.442695, %v3427_v41  ;;  %v2563_v41 = vpack.c.bf16 %v7273_v32, %v7273_v32  ;;  %v2566_v32 = vpack.c.bf16 %v7284_v7, %v7284_v7  ;;  %v2565_v7 = vpack.c.bf16 %v7279_v43, %v7279_v43 }
 0x3ce   : > { %6172 = vpow2.f32 %v3455_v26  ;;  %v7526_v31 = vpop.permute.xlu1 %2005 }
 0x3d1   : > { %3489 = vadd.xlane.f32.xlu1 %v3488_v12 }
 0x3d2   : > { %v7496_v50 = vpop.eup %6166  ;;  %v3412_v49 = vpop.xlane.xlu0 %3411 }
 0x3d3   : > { %v3497_v51 = vsel %vm2574_vm1, %v7496_v50, 0.0  ;;  %v7500_v0 = vpop.eup %6168  ;;  %v3428_v13 = vsub.f32 %v7434_v15, %v3412_v49 }
 0x3d4   : > { %3498 = vadd.xlane.f32.xlu0 %v3497_v51  ;;  %v3482_v39 = vsel %vm2574_vm1, %v7500_v0, 0.0  ;;  %v7504_v16 = vpop.eup %6170 }
 0x3d5   : > { %v3494_v47 = vsel %vm2574_vm1, %v7504_v16, 0.0  ;;  %v3459_v29 = vmul.f32 1.442695, %v3428_v13 }
 0x3d6   : > { %v7535_v17 = vpop.permute.xlu0 %2002 }
 0x3d7   : > { %6174 = vpow2.f32 %v3459_v29  ;;  %v3838_v29 = vsel %vm3560_vm2, %v2564_v42, 0 }
 0x3d8   : > { %3483 = vadd.xlane.f32.xlu0 %v3482_v39  ;;  %6176 = vpow2.f32 %v3457_v14  ;;  %v3746_v39 = vsel %vm3560_vm2, %v2562_v48, 0 }
 0x3db   : > { %v7508_v6 = vpop.eup %6172 }
 0x3dc   : > { %3495 = vadd.xlane.f32.xlu0 %v3494_v47  ;;  %v3500_v1 = vsel %vm2574_vm1, %v7508_v6, 0.0 }
 0x3dd   : > { %3501 = vadd.xlane.f32.xlu1 %v3500_v1 }
 0x3e4   : > { %v7518_v46 = vpop.eup %6174 }
 0x3e5   : > { %v7520_v25 = vpop.eup %6176  ;;  %v3506_v45 = vsel %vm2574_vm1, %v7518_v46, 0.0 }
 0x3ee   : > { %2008 = vrot.lane.b32.xlu1 %v6560_v38, %s7929_s11 }
 0x3f2   : > { %2011 = vrot.lane.b32.xlu0 %v6560_v38, %s6328_s15  ;;  %v3503_v38 = vsel %vm2574_vm1, %v7520_v25, 0.0 }
 0x411   : > { %3507 = vadd.xlane.f32.xlu0 %v3506_v45 }
 0x412   : > { %3504 = vadd.xlane.f32.xlu1 %v3503_v38 }
 0x417   : > { %v3463_v15 = vpop.xlane.xlu1 %3462 }
 0x418   : > { %6178 = vrcp.f32 %v3463_v15 }
 0x425   : > { %v6179_v34 = vpop.eup %6178 }
 0x426   : > { %v3510_v8 = vmul.f32 %v6179_v34, %v7443_v23 }
 0x428   : > { %v3541_v58 = vpack.c.bf16 %v3510_v8, %v3510_v8 }
 0x42a   : > { %5843 = vmatmul.mubr.msk.bf16.vlgmr.msra.gmra.mxu0 %vm2574_vm1, %v3541_v58 }
 0x42b   : > { %5853 = vmatpush3.bf16.msra.mxu0 %v3654_v30  ;;  %5854 = vmatprep.mubr.msk.bf16.mxu0 %vm6313_vm0, %v6311_v4 }
 0x42c   : > { %5864 = vmatprep.subr.bf16.mxu0 %v6311_v4 }
 0x430   : > { %v3475_v28 = vpop.xlane.xlu0 %3474 }
 0x434   : > { %v3466_v55 = vpop.xlane.xlu0 %3465 }
 0x435   : > { %6180 = vrcp.f32 %v3466_v55 }
 0x43c   : > { %v3481_v23 = vpop.xlane.xlu1 %3480 }
 0x440   : > { %v3469_v54 = vpop.xlane.xlu1 %3468 }
 0x441   : > { %6182 = vrcp.f32 %v3469_v54 }
 0x442   : > { %v6181_v27 = vpop.eup %6180  ;;  %6184 = vrcp.f32 %v3475_v28 }
 0x443   : > { %v3512_v19 = vmul.f32 %v6181_v27, %v7455_v59  ;;  %v3884_v27 = vsel %vm3560_vm2, %v2565_v7, 0 }
 0x445   : > { %v3542_v52 = vpack.c.bf16 %v3512_v19, %v3512_v19 }
 0x447   : > { %5849 = vmatmul.mubr.msk.bf16.vlgmr.msra.gmra.mxu1 %vm2574_vm1, %v3542_v52 }
 0x448   : > { %v3487_v20 = vpop.xlane.xlu0 %3486  ;;  %5859 = vmatpush3.bf16.msra.mxu1 %v3700_v18  ;;  %5860 = vmatprep.mubr.msk.bf16.mxu1 %vm6313_vm0, %v6311_v4 }
 0x449   : > { %5870 = vmatprep.subr.bf16.mxu1 %v6311_v4 }
 0x44c   : > { %v3472_v56 = vpop.xlane.xlu0 %3471 }
 0x44d   : > { %6186 = vrcp.f32 %v3472_v56 }
 0x44e   : > { %6188 = vrcp.f32 %v3481_v23  ;;  %v6183_v59 = vpop.eup %6182  ;;  %v2568_v23 = vpack.c.bf16 %v7293_v3, %v7293_v3 }
 0x44f   : > { %v3514_v5 = vmul.f32 %v6183_v59, %v7465_v11  ;;  %v6185_v12 = vpop.eup %6184  ;;  %6190 = vrcp.f32 %v3487_v20 }
 0x450   : > { %v3518_v47 = vmul.f32 %v6185_v12, %v7451_v40  ;;  %v4022_v3 = vsel %vm3560_vm2, %v2568_v23, 0 }
 0x451   : > { %v3543_v26 = vpack.c.bf16 %v3514_v5, %v3514_v5 }
 0x452   : > { %v3493_v51 = vpop.xlane.xlu1 %3492  ;;  %v3545_v49 = vpack.c.bf16 %v3518_v47, %v3518_v47 }
 0x453   : > { %5855 = vmatmul.mubr.msk.bf16.vlgmr.msra.gmra.mxu0 %vm2574_vm1, %v3543_v26 }
 0x454   : > { %5865 = vmatpush3.bf16.msra.mxu0 %v3746_v39  ;;  %5866 = vmatprep.mubr.msk.bf16.mxu0 %vm6313_vm0, %v6311_v4 }
 0x455   : > { %5876 = vmatprep.subr.bf16.mxu0 %v6311_v4 }
 0x456   : > { %v3478_v11 = vpop.xlane.xlu1 %3477 }
 0x457   : > { %6192 = vrcp.f32 %v3478_v11 }
 0x458   : > { %6194 = vrcp.f32 %v3493_v51 }
 0x45a   : > { %v6187_v1 = vpop.eup %6186  ;;  %v3490_v34 = vpop.xlane.xlu1 %3489 }
 0x45b   : > { %v6189_v2 = vpop.eup %6188  ;;  %v3516_v13 = vmul.f32 %v6187_v1, %v7476_v24  ;;  %5867 = vmatmul.mubr.msk.bf16.vlgmr.msra.gmra.mxu0 %vm2574_vm1, %v3545_v49  ;;  %v3792_v24 = vsel %vm3560_vm2, %v2563_v41, 0 }
 0x45c   : > { %5877 = vmatpush3.bf16.msra.mxu0 %v3838_v29  ;;  %5878 = vmatprep.mubr.msk.bf16.mxu0 %vm6313_vm0, %v6311_v4  ;;  %v3522_v37 = vmul.f32 %v6189_v2, %v7461_v10  ;;  %v6191_v15 = vpop.eup %6190  ;;  %v3930_v10 = vsel %vm3560_vm2, %v2566_v32, 0 }
 0x45d   : > { %v3544_v14 = vpack.c.bf16 %v3516_v13, %v3516_v13  ;;  %v3499_v40 = vpop.xlane.xlu0 %3498  ;;  %5888 = vmatprep.subr.bf16.mxu0 %v6311_v4  ;;  %v3526_v30 = vmul.f32 %v6191_v15, %v7472_v62 }
 0x45e   : > { %v3547_v38 = vpack.c.bf16 %v3522_v37, %v3522_v37 }
 0x45f   : > { %5861 = vmatmul.mubr.msk.bf16.vlgmr.msra.gmra.mxu1 %vm2574_vm1, %v3544_v14  ;;  %v3549_v19 = vpack.c.bf16 %v3526_v30, %v3526_v30 }
 0x460   : > { %5871 = vmatpush3.bf16.msra.mxu1 %v3792_v24  ;;  %5872 = vmatprep.mubr.msk.bf16.mxu1 %vm6313_vm0, %v6311_v4 }
 0x461   : > { %5882 = vmatprep.subr.bf16.mxu1 %v6311_v4  ;;  %v3484_v45 = vpop.xlane.xlu0 %3483 }
 0x462   : > { %6196 = vrcp.f32 %v3484_v45 }
 0x463   : > { %5879 = vmatmul.mubr.msk.bf16.vlgmr.msra.gmra.mxu0 %vm2574_vm1, %v3547_v38  ;;  %6198 = vrcp.f32 %v3490_v34 }
 0x464   : > { %v6193_v8 = vpop.eup %6192  ;;  %5889 = vmatpush3.bf16.msra.mxu0 %v3930_v10  ;;  %5890 = vmatprep.mubr.msk.bf16.mxu0 %vm6313_vm0, %v6311_v4  ;;  %6200 = vrcp.f32 %v3499_v40 }
 0x465   : > { %v3496_v33 = vpop.xlane.xlu0 %3495  ;;  %v3520_v58 = vmul.f32 %v6193_v8, %v7487_v36  ;;  %5900 = vmatprep.subr.bf16.mxu0 %v6311_v4  ;;  %v6195_v36 = vpop.eup %6194  ;;  %v2569_v8 = vpack.c.bf16 %v7295_v35, %v7295_v35 }
 0x466   : > { %v3502_v28 = vpop.xlane.xlu1 %3501  ;;  %6202 = vrcp.f32 %v3496_v33 }
 0x467   : > { %v3546_v55 = vpack.c.bf16 %v3520_v58, %v3520_v58  ;;  %6204 = vrcp.f32 %v3502_v28 }
 0x469   : > { %v2012_v54 = vpop.permute.xlu0 %2011  ;;  %5873 = vmatmul.mubr.msk.bf16.vlgmr.msra.gmra.mxu1 %vm2574_vm1, %v3546_v55 }
 0x46a   : > { %v2198_v44 = vcombine.low %v7526_v31, %v2012_v54  ;;  %v2199_v43 = vcombine.high %v7526_v31, %v2012_v54  ;;  %5883 = vmatpush3.bf16.msra.mxu1 %v3884_v27  ;;  %5884 = vmatprep.mubr.msk.bf16.mxu1 %vm6313_vm0, %v6311_v4  ;;  %v2009_v62 = vpop.permute.xlu1 %2008  ;;  %v3530_v31 = vmul.f32 %v6195_v36, %v7483_v9 }
 0x46b   : > { %5894 = vmatprep.subr.bf16.mxu1 %v6311_v4  ;;  %5891 = vmatmul.mubr.msk.bf16.vlgmr.msra.gmra.mxu0 %vm2574_vm1, %v3549_v19  ;;  %v2182_v52 = vcombine.low %v7535_v17, %v2009_v62  ;;  %v2183_v20 = vcombine.high %v7535_v17, %v2009_v62  ;;  %v2567_v9 = vpack.c.bf16 %v7286_v60, %v7286_v60  ;;  %v4068_v19 = vsel %vm3560_vm2, %v2569_v8, 0 }
 0x46c   : > { %5901 = vmatpush3.bf16.msra.mxu0 %v4022_v3  ;;  %5902 = vmatprep.mubr.msk.bf16.mxu0 %vm6313_vm0, %v6311_v4  ;;  %v2206_v18 = vrot.slane %v2198_v44, %v6651_v57  ;;  %v2213_v56 = vrot.slane %v2199_v43, %v6651_v57  ;;  %v3551_v47 = vpack.c.bf16 %v3530_v31, %v3530_v31 }
 0x46d   : > { %5912 = vmatprep.subr.bf16.mxu0 %v6311_v4  ;;  %v2190_v59 = vrot.slane %v2182_v52, %v6651_v57  ;;  %v2197_v5 = vrot.slane %v2183_v20, %v6651_v57  ;;  %v3976_v60 = vsel %vm3560_vm2, %v2567_v9, 0 }
 0x46f   : > { %v6197_v48 = vpop.eup %6196  ;;  %v2246_v17 = vcombine.low %v2190_v59, %v2206_v18  ;;  %v2247_v26 = vcombine.high %v2190_v59, %v2206_v18  ;;  %v2262_v12 = vcombine.low %v2197_v5, %v2213_v56  ;;  %v2263_v51 = vcombine.high %v2197_v5, %v2213_v56 }
 0x470   : > { %v3524_v39 = vmul.f32 %v6197_v48, %v7500_v0  ;;  %v6199_v13 = vpop.eup %6198 }
 0x471   : > { %v2254_v11 = vrot.slane %v2246_v17, %v6656_v63  ;;  %v2261_v42 = vrot.slane %v2247_v26, %v6656_v63  ;;  %v2270_v1 = vrot.slane %v2262_v12, %v6656_v63  ;;  %v2277_v49 = vrot.slane %v2263_v51, %v6656_v63  ;;  %v6201_v33 = vpop.eup %6200 }
 0x472   : > { %v3548_v2 = vpack.c.bf16 %v3524_v39, %v3524_v39  ;;  %v3528_v45 = vmul.f32 %v6199_v13, %v7492_v22  ;;  %v3534_v36 = vmul.f32 %v6201_v33, %v7496_v50 }
 0x473   : > { %5903 = vmatmul.mubr.msk.bf16.vlgmr.msra.gmra.mxu0 %vm2574_vm1, %v3551_v47  ;;  %v5536_v41 = vcombine.low %v2254_v11, %v2261_v42  ;;  %v5538_v29 = vcombine.high %v2254_v11, %v2261_v42  ;;  %v5540_v14 = vcombine.low %v2270_v1, %v2277_v49  ;;  %v5542_v0 = vcombine.high %v2270_v1, %v2277_v49  ;;  %v6203_v23 = vpop.eup %6202 }
 0x474   : > { %5914 = vmatprep.mubr.msk.bf16.mxu0 %vm6313_vm0, %v6311_v4  ;;  %5885 = vmatmul.mubr.msk.bf16.vlgmr.msra.gmra.mxu1 %vm2574_vm1, %v3548_v2  ;;  %v3550_v55 = vpack.c.bf16 %v3528_v45, %v3528_v45  ;;  %v3532_v44 = vmul.f32 %v6203_v23, %v7504_v16  ;;  %v3553_v52 = vpack.c.bf16 %v3534_v36, %v3534_v36  ;;  %v6205_v18 = vpop.eup %6204 }
 0x475   : > { %v2437_v40 = vrot.slane %v5536_v41, %v6651_v57  ;;  %v2453_v37 = vrot.slane %v5538_v29, %v6651_v57  ;;  %v2469_v24 = vrot.slane %v5540_v14, %v6651_v57  ;;  %v2485_v32 = vrot.slane %v5542_v0, %v6651_v57  ;;  %5895 = vmatpush3.bf16.msra.mxu1 %v3976_v60 }
 0x476   : > { %5896 = vmatprep.mubr.msk.bf16.mxu1 %vm6313_vm0, %v6311_v4  ;;  %5906 = vmatprep.subr.bf16.mxu1 %v6311_v4  ;;  %v3552_v20 = vpack.c.bf16 %v3532_v44, %v3532_v44  ;;  %v3536_v56 = vmul.f32 %v6205_v18, %v7508_v6 }
 0x477   : > { %v2502_v38 = vcombine.low %v2437_v40, %v2453_v37  ;;  %v2534_v15 = vcombine.low %v2469_v24, %v2485_v32  ;;  %v2503_v34 = vcombine.high %v2437_v40, %v2453_v37  ;;  %v2535_v10 = vcombine.high %v2469_v24, %v2485_v32 }
 0x478   : > { %v3554_v5 = vpack.c.bf16 %v3536_v56, %v3536_v56 }
 0x479   : > { %v2510_v58 = vrot.slane %v2502_v38, %v6656_v63  ;;  %v2542_v7 = vrot.slane %v2534_v15, %v6656_v63  ;;  %v2517_v30 = vrot.slane %v2503_v34, %v6656_v63  ;;  %v2549_v28 = vrot.slane %v2535_v10, %v6656_v63 }
 0x47b   : > { %v2554_v54 = vcombine.low %v2510_v58, %v2542_v7  ;;  %v2555_v22 = vcombine.high %v2510_v58, %v2542_v7  ;;  %v2556_v27 = vcombine.low %v2517_v30, %v2549_v28  ;;  %v2557_v16 = vcombine.high %v2517_v30, %v2549_v28 }
 0x47c   : > { %5897 = vmatmul.mubr.msk.bf16.vlgmr.msra.gmra.mxu1 %vm2574_vm1, %v3550_v55 }
 0x47d   : > { %5907 = vmatpush3.bf16.msra.mxu1 %v4068_v19  ;;  %5908 = vmatprep.mubr.msk.bf16.mxu1 %vm6313_vm0, %v6311_v4  ;;  %v2570_v35 = vpack.c.bf16 %v2554_v54, %v2554_v54  ;;  %v2571_v43 = vpack.c.bf16 %v2555_v22, %v2555_v22  ;;  %v2572_v3 = vpack.c.bf16 %v2556_v27, %v2556_v27 }
 0x47e   : > { %5918 = vmatprep.subr.bf16.mxu1 %v6311_v4  ;;  %v2573_v59 = vpack.c.bf16 %v2557_v16, %v2557_v16 }
 0x47f   : > { %v4114_v62 = vsel %vm3560_vm2, %v2570_v35, 0  ;;  %v4160_v31 = vsel %vm3560_vm2, %v2571_v43, 0  ;;  %v4206_v50 = vsel %vm3560_vm2, %v2572_v3, 0 }
 0x480   : > { %5913 = vmatpush3.bf16.msra.mxu0 %v4114_v62  ;;  %v4252_v48 = vsel %vm3560_vm2, %v2573_v59, 0 }
 0x481   : > { %5924 = vmatprep.subr.bf16.mxu0 %v6311_v4 }
 0x483   : > { %5915 = vmatmul.mubr.msk.bf16.vlgmr.msra.gmra.mxu0 %vm2574_vm1, %v3553_v52 }
 0x484   : > { %5909 = vmatmul.mubr.msk.bf16.vlgmr.msra.gmra.mxu1 %vm2574_vm1, %v3552_v20  ;;  %5925 = vmatpush3.bf16.msra.mxu0 %v4206_v50 }
 0x485   : > { %5919 = vmatpush3.bf16.msra.mxu1 %v4160_v31  ;;  %5920 = vmatprep.mubr.msk.bf16.mxu1 %vm6313_vm0, %v6311_v4 }
 0x486   : > { %5930 = vmatprep.subr.bf16.mxu1 %v6311_v4  ;;  %5926 = vmatprep.mubr.msk.bf16.mxu0 %vm6313_vm0, %v6311_v4 }
 0x487   : > { %5936 = vmatprep.subr.bf16.mxu0 %v6311_v4 }
 0x48c   : > { %5921 = vmatmul.mubr.msk.bf16.vlgmr.msra.gmra.mxu1 %vm2574_vm1, %v3554_v5 }
 0x48d   : > { %5931 = vmatpush3.bf16.msra.mxu1 %v4252_v48  ;;  %5932 = vmatprep.mubr.msk.bf16.mxu1 %vm6313_vm0, %v6311_v4 }
 0x48e   : > { %5956 = vmatprep.subr.bf16.mxu1 %v6311_v4 }
 0x49a   : > { %v3508_v17 = vpop.xlane.xlu0 %3507 }
 0x49b   : > { %6206 = vrcp.f32 %v3508_v17  ;;  %v3505_v6 = vpop.xlane.xlu1 %3504 }
 0x49c   : > { %6208 = vrcp.f32 %v3505_v6 }
 0x4a8   : > { %v6207_v26 = vpop.eup %6206 }
 0x4a9   : > { %v3540_v12 = vmul.f32 %v6207_v26, %v7518_v46  ;;  %v6209_v51 = vpop.eup %6208 }
 0x4aa   : > { %v3538_v9 = vmul.f32 %v6209_v51, %v7520_v25 }
 0x4ab   : > { %v3556_v39 = vpack.c.bf16 %v3540_v12, %v3540_v12 }
 0x4ac   : > { %v3555_v47 = vpack.c.bf16 %v3538_v9, %v3538_v9 }
 0x4ad   : > { %5933 = vmatmul.mubr.msk.bf16.vlgmr.msra.gmra.mxu1 %vm2574_vm1, %v3556_v39 }
 0x4ae   : > { %5972 = vmatprep.mubr.msk.bf16.mxu1 %vm6313_vm0, %v6311_v4  ;;  %5927 = vmatmul.mubr.msk.bf16.vlgmr.msra.gmra.mxu0 %vm2574_vm1, %v3555_v47 }
 0x4af   : > { %5952 = vmatprep.mubr.msk.bf16.mxu0 %vm6313_vm0, %v6311_v4 }
 0x4ea   : > { %v3598_v11 = vpop.f32.mrf.mxu0 }
 0x4ec   : > { %v5844_v42 = vpop.f32.mrf.mxu0 }
 0x4ee   : > { %v3601_v1 = vpop.f32.mrf.mxu0 }
 0x4f0   : > { %v5845_v49 = vpop.f32.mrf.mxu0 }
 0x507   : > { %v3644_v46 = vpop.f32.mrf.mxu1 }
 0x509   : > { %v5850_v2 = vpop.f32.mrf.mxu1 }
 0x50b   : > { %v3647_v13 = vpop.f32.mrf.mxu1 }
 0x50d   : > { %v5851_v41 = vpop.f32.mrf.mxu1 }
 0x513   : > { %v3690_v25 = vpop.f32.mrf.mxu0 }
 0x514   : > { %v4294_v40 = vcombine.low %v3598_v11, %v3690_v25  ;;  %v4295_v37 = vcombine.high %v3598_v11, %v3690_v25 }
 0x515   : > { %v5856_v29 = vpop.f32.mrf.mxu0 }
 0x516   : > { %v4302_v10 = vrot.slane %v4294_v40, %v6651_v57  ;;  %v4309_v8 = vrot.slane %v4295_v37, %v6651_v57 }
 0x517   : > { %v3693_v14 = vpop.f32.mrf.mxu0 }
 0x519   : > { %v5857_v0 = vpop.f32.mrf.mxu0 }
 0x51b   : > { %v7662_v60 = vpop.f32.mrf.mxu0 }
 0x51d   : > { %v5868_v24 = vpop.f32.mrf.mxu0 }
 0x51f   : > { %v3736_v32 = vpop.f32.mrf.mxu1  ;;  %v3785_v15 = vpop.f32.mrf.mxu0 }
 0x520   : > { %v4310_v45 = vcombine.low %v3644_v46, %v3736_v32  ;;  %v4311_v38 = vcombine.high %v3644_v46, %v3736_v32 }
 0x521   : > { %v5862_v34 = vpop.f32.mrf.mxu1  ;;  %v5869_v7 = vpop.f32.mrf.mxu0 }
 0x522   : > { %v4318_v33 = vrot.slane %v4310_v45, %v6651_v57  ;;  %v4325_v58 = vrot.slane %v4311_v38, %v6651_v57 }
 0x523   : > { %v3739_v30 = vpop.f32.mrf.mxu1  ;;  %v3874_v22 = vpop.f32.mrf.mxu0 }
 0x524   : > { %v4358_v28 = vcombine.low %v4302_v10, %v4318_v33  ;;  %v4359_v55 = vcombine.high %v4302_v10, %v4318_v33  ;;  %v4374_v23 = vcombine.low %v4309_v8, %v4325_v58  ;;  %v4375_v54 = vcombine.high %v4309_v8, %v4325_v58 }
 0x525   : > { %v5863_v27 = vpop.f32.mrf.mxu1  ;;  %v5880_v43 = vpop.f32.mrf.mxu0  ;;  %v4326_v0 = vcombine.low %v7662_v60, %v3874_v22  ;;  %v4327_v40 = vcombine.high %v7662_v60, %v3874_v22 }
 0x526   : > { %v4366_v19 = vrot.slane %v4358_v28, %v6656_v63  ;;  %v4373_v35 = vrot.slane %v4359_v55, %v6656_v63  ;;  %v4382_v36 = vrot.slane %v4374_v23, %v6656_v63  ;;  %v4389_v44 = vrot.slane %v4375_v54, %v6656_v63 }
 0x527   : > { %v3877_v31 = vpop.f32.mrf.mxu0  ;;  %v4334_v34 = vrot.slane %v4326_v0, %v6651_v57  ;;  %v4341_v10 = vrot.slane %v4327_v40, %v6651_v57 }
 0x528   : > { %v5575_v62 = vcombine.low %v4366_v19, %v4373_v35  ;;  %v5577_v3 = vcombine.high %v4366_v19, %v4373_v35  ;;  %v5579_v52 = vcombine.low %v4382_v36, %v4389_v44  ;;  %v5581_v20 = vcombine.high %v4382_v36, %v4389_v44 }
 0x529   : > { %v3828_v18 = vpop.f32.mrf.mxu1  ;;  %v5881_v50 = vpop.f32.mrf.mxu0 }
 0x52a   : > { %v4574_v16 = vrot.slane %v5575_v62, %v6651_v57  ;;  %v4590_v56 = vrot.slane %v5577_v3, %v6651_v57  ;;  %v4606_v59 = vrot.slane %v5579_v52, %v6651_v57  ;;  %v4622_v5 = vrot.slane %v5581_v20, %v6651_v57 }
 0x52b   : > { %v5874_v48 = vpop.f32.mrf.mxu1  ;;  %v7676_v17 = vpop.f32.mrf.mxu0 }
 0x52c   : > { %v4631_v6 = vcombine.high %v4574_v16, %v4590_v56  ;;  %v4663_v26 = vcombine.high %v4606_v59, %v4622_v5  ;;  %v4630_v12 = vcombine.low %v4574_v16, %v4590_v56  ;;  %v4662_v51 = vcombine.low %v4606_v59, %v4622_v5 }
 0x52d   : > { %v3831_v39 = vpop.f32.mrf.mxu1  ;;  %v5892_v9 = vpop.f32.mrf.mxu0 }
 0x52e   : > { %v4645_v47 = vrot.slane %v4631_v6, %v6656_v63  ;;  %v4677_v11 = vrot.slane %v4663_v26, %v6656_v63  ;;  %v7681_v42 = vrot.slane %v4630_v12, %v6656_v63  ;;  %v7684_v1 = vrot.slane %v4662_v51, %v6656_v63 }
 0x52f   : > { %v5875_v49 = vpop.f32.mrf.mxu1  ;;  %v3969_v13 = vpop.f32.mrf.mxu0 }
 0x530   : > { %v4696_v46 = vcombine.low %v4645_v47, %v4677_v11  ;;  %v4695_v2 = vcombine.high %v7681_v42, %v7684_v1  ;;  %v4694_v41 = vcombine.low %v7681_v42, %v7684_v1  ;;  %v4697_v29 = vcombine.high %v4645_v47, %v4677_v11 }
 0x531   : > { %v5893_v25 = vpop.f32.mrf.mxu0 }
 0x532   : > { %4843 = vrot.lane.b32.xlu1 %v4696_v46, %s7929_s11  ;;  %4839 = vrot.lane.b32.xlu0 %v4695_v2, %s6328_s15 }
 0x533   : > { %v4058_v14 = vpop.f32.mrf.mxu0 }
 0x534   : > { %v3920_v37 = vpop.f32.mrf.mxu1  ;;  %v4430_v48 = vcombine.low %v7676_v17, %v4058_v14  ;;  %v4431_v26 = vcombine.high %v7676_v17, %v4058_v14 }
 0x535   : > { %v5904_v24 = vpop.f32.mrf.mxu0  ;;  %v4342_v32 = vcombine.low %v3828_v18, %v3920_v37  ;;  %v4343_v45 = vcombine.high %v3828_v18, %v3920_v37 }
 0x536   : > { %4847 = vrot.lane.b32.xlu1 %v4697_v29, %s6327_s22  ;;  %v5886_v38 = vpop.f32.mrf.mxu1  ;;  %v4438_v29 = vrot.slane %v4430_v48, %v6651_v57  ;;  %v4445_v17 = vrot.slane %v4431_v26, %v6651_v57  ;;  %s7930_s22 = smov 80  }
 0x537   : > { %v4061_v15 = vpop.f32.mrf.mxu0  ;;  %v4350_v8 = vrot.slane %v4342_v32, %v6651_v57  ;;  %v4357_v33 = vrot.slane %v4343_v45, %v6651_v57 }
 0x538   : > { %v3923_v58 = vpop.f32.mrf.mxu1 }
 0x539   : > { %v5905_v7 = vpop.f32.mrf.mxu0  ;;  %v4390_v30 = vcombine.low %v4334_v34, %v4350_v8  ;;  %v4391_v60 = vcombine.high %v4334_v34, %v4350_v8  ;;  %v4406_v28 = vcombine.low %v4341_v10, %v4357_v33  ;;  %v4407_v55 = vcombine.high %v4341_v10, %v4357_v33 }
 0x53a   : > { %v5887_v23 = vpop.f32.mrf.mxu1 }
 0x53b   : > { %v4398_v54 = vrot.slane %v4390_v30, %v6656_v63  ;;  %v4405_v22 = vrot.slane %v4391_v60, %v6656_v63  ;;  %v4414_v27 = vrot.slane %v4406_v28, %v6656_v63  ;;  %v4421_v19 = vrot.slane %v4407_v55, %v6656_v63 }
 0x53c   : > { %v4012_v35 = vpop.f32.mrf.mxu1 }
 0x53d   : > { %v5576_v36 = vcombine.low %v4398_v54, %v4405_v22  ;;  %v5578_v44 = vcombine.high %v4398_v54, %v4405_v22  ;;  %v5580_v43 = vcombine.low %v4414_v27, %v4421_v19  ;;  %v5582_v62 = vcombine.high %v4414_v27, %v4421_v19  ;;  %v6120_v19 = vld [vmem:[%s6482_s10 + $0x38] sm:$0xff]  }
 0x53e   : > { %v5898_v3 = vpop.f32.mrf.mxu1  ;;  %5937 = vmatpush3.bf16.msra.mxu0 %v6120_v19 }
 0x53f   : > { %v4581_v52 = vrot.slane %v5576_v36, %v6651_v57  ;;  %v4597_v20 = vrot.slane %v5578_v44, %v6651_v57  ;;  %v4613_v31 = vrot.slane %v5580_v43, %v6651_v57  ;;  %v4629_v18 = vrot.slane %v5582_v62, %v6651_v57  ;;  %v6121_v3 = vld [vmem:[%s6482_s10 + $0x30] sm:$0xff]   ;;  %5938 = vmatprep.subr.bf16.mxu0 %v6311_v4 }
 0x540   : > { %v4015_v50 = vpop.f32.mrf.mxu1 }
 0x541   : > { %v4646_v16 = vcombine.low %v4581_v52, %v4597_v20  ;;  %v4678_v56 = vcombine.low %v4613_v31, %v4629_v18  ;;  %v4647_v59 = vcombine.high %v4581_v52, %v4597_v20  ;;  %v4679_v5 = vcombine.high %v4613_v31, %v4629_v18 }
 0x542   : > { %v5899_v6 = vpop.f32.mrf.mxu1  ;;  %5939 = vmatpush3.bf16.msra.mxu0 %v6121_v3 }
 0x543   : > { %v7709_v12 = vpop.f32.mrf.mxu0  ;;  %v4654_v51 = vrot.slane %v4646_v16, %v6656_v63  ;;  %v4686_v39 = vrot.slane %v4678_v56, %v6656_v63  ;;  %v4661_v47 = vrot.slane %v4647_v59, %v6656_v63  ;;  %v4693_v11 = vrot.slane %v4679_v5, %v6656_v63  ;;  %v6122_v59 = vld [vmem:[%s6482_s10 + $0x28] sm:$0xff]   ;;  %5940 = vmatprep.subr.bf16.mxu0 %v6311_v4 }
 0x544   : > { %v4104_v9 = vpop.f32.mrf.mxu1 }
 0x545   : > { %v4446_v49 = vcombine.low %v4012_v35, %v4104_v9  ;;  %v4447_v46 = vcombine.high %v4012_v35, %v4104_v9  ;;  %v4699_v2 = vcombine.high %v4654_v51, %v4686_v39  ;;  %v4698_v13 = vcombine.low %v4654_v51, %v4686_v39  ;;  %v5916_v25 = vpop.f32.mrf.mxu0  ;;  %v6123_v51 = vld [vmem:[%s6482_s10 + $0x20] sm:$0xff]  }
 0x546   : > { %v5910_v0 = vpop.f32.mrf.mxu1  ;;  %v4701_v32 = vcombine.high %v4661_v47, %v4693_v11  ;;  %v4700_v33 = vcombine.low %v4661_v47, %v4693_v11  ;;  %5941 = vmatpush3.bf16.msra.mxu0 %v6122_v59  ;;  %v6124_v47 = vld [vmem:[%s6482_s10 + $0x18] sm:$0xff]   ;;  %v6125_v11 = vld [vmem:[%s6482_s10 + $0x10] sm:$0xff]  }
 0x547   : > { %v4454_v14 = vrot.slane %v4446_v49, %v6651_v57  ;;  %v4461_v40 = vrot.slane %v4447_v46, %v6651_v57  ;;  %4855 = vrot.lane.b32.xlu1 %v4699_v2, %s6326_s23  ;;  %4851 = vrot.lane.b32.xlu0 %v4698_v13, %s6323_s20  ;;  %v4153_v37 = vpop.f32.mrf.mxu0  ;;  %s7935_s20 = scalar_lea.vmem %s7886_s6, %s6463_s12 }
 0x548   : > { %v4107_v24 = vpop.f32.mrf.mxu1  ;;  %5942 = vmatprep.subr.bf16.mxu0 %v6311_v4 }
 0x549   : > { %v4494_v45 = vcombine.low %v4438_v29, %v4454_v14  ;;  %v4495_v38 = vcombine.high %v4438_v29, %v4454_v14  ;;  %v4510_v15 = vcombine.low %v4445_v17, %v4461_v40  ;;  %v4511_v34 = vcombine.high %v4445_v17, %v4461_v40  ;;  %v5917_v10 = vpop.f32.mrf.mxu0 }
 0x54a   : > { %v5911_v8 = vpop.f32.mrf.mxu1  ;;  %5943 = vmatpush3.bf16.msra.mxu0 %v6123_v51 }
 0x54b   : > { %v4502_v58 = vrot.slane %v4494_v45, %v6656_v63  ;;  %v4509_v7 = vrot.slane %v4495_v38, %v6656_v63  ;;  %v4518_v30 = vrot.slane %v4510_v15, %v6656_v63  ;;  %v4525_v60 = vrot.slane %v4511_v34, %v6656_v63  ;;  %4863 = vrot.lane.b32.xlu1 %v4701_v32, %s6325_s17 }
 0x54c   : > { %4859 = vrot.lane.b32.xlu0 %v4700_v33, %s6320_s30  ;;  %v4196_v28 = vpop.f32.mrf.mxu1  ;;  %5944 = vmatprep.subr.bf16.mxu0 %v6311_v4  ;;  %s7933_s30 = smov 120  }
 0x54d   : > { %v5583_v55 = vcombine.low %v4502_v58, %v4509_v7  ;;  %v5585_v23 = vcombine.high %v4502_v58, %v4509_v7  ;;  %v5587_v54 = vcombine.low %v4518_v30, %v4525_v60  ;;  %v5589_v22 = vcombine.high %v4518_v30, %v4525_v60  ;;  %v6126_v58 = vld [vmem:[%s6482_s10 + $0x8] sm:$0xff]  }
 0x54e   : > { %v5922_v27 = vpop.f32.mrf.mxu1  ;;  %5945 = vmatpush3.bf16.msra.mxu0 %v6124_v47 }
 0x54f   : > { %v4710_v35 = vrot.slane %v5583_v55, %v6651_v57  ;;  %v4726_v36 = vrot.slane %v5585_v23, %v6651_v57  ;;  %v4742_v44 = vrot.slane %v5587_v54, %v6651_v57  ;;  %v4758_v43 = vrot.slane %v5589_v22, %v6651_v57  ;;  %5946 = vmatprep.subr.bf16.mxu0 %v6311_v4 }
 0x550   : > { %v4199_v62 = vpop.f32.mrf.mxu1 }
 0x551   : > { %v4766_v52 = vcombine.low %v4710_v35, %v4726_v36  ;;  %v4798_v20 = vcombine.low %v4742_v44, %v4758_v43  ;;  %v4767_v31 = vcombine.high %v4710_v35, %v4726_v36  ;;  %v4799_v18 = vcombine.high %v4742_v44, %v4758_v43  ;;  %v6127_v36 = vld [vmem:[%s6482_s10] sm:$0xff]   ;;  %s7932_s10 = smov 96  }
 0x552   : > { %v5923_v50 = vpop.f32.mrf.mxu1  ;;  %5947 = vmatpush3.bf16.msra.mxu0 %v6125_v11 }
 0x553   : > { %v4774_v16 = vrot.slane %v4766_v52, %v6656_v63  ;;  %v4806_v56 = vrot.slane %v4798_v20, %v6656_v63  ;;  %v4781_v6 = vrot.slane %v4767_v31, %v6656_v63  ;;  %v4813_v26 = vrot.slane %v4799_v18, %v6656_v63  ;;  %5948 = vmatprep.subr.bf16.mxu0 %v6311_v4 }
 0x555   : > { %v4831_v5 = vcombine.high %v4774_v16, %v4806_v56  ;;  %v4830_v48 = vcombine.low %v4774_v16, %v4806_v56  ;;  %v4833_v39 = vcombine.high %v4781_v6, %v4813_v26  ;;  %v4832_v9 = vcombine.low %v4781_v6, %v4813_v26 }
 0x556   : > { %5949 = vmatpush3.bf16.msra.mxu0 %v6126_v58  ;;  %v6212_v58 = vld [vmem:[#allocation2] sm:$0xff] }
 0x557   : > { %4871 = vrot.lane.b32.xlu1 %v4831_v5, %s6322_s19  ;;  %4867 = vrot.lane.b32.xlu0 %v4830_v48, %s6319_s24  ;;  %s7931_s24 = smov 104  }
 0x558   : > { %5950 = vmatprep.subr.bf16.mxu0 %v6311_v4 }
 0x55a   : > { %5951 = vmatpush3.bf16.msra.mxu0 %v6127_v36  ;;  %v6137_v36 = vld [vmem:[%s6501_s13 + $0x30] sm:$0xff]  }
 0x55b   : > { %4879 = vrot.lane.b32.xlu1 %v4833_v39, %s6321_s21  ;;  %4875 = vrot.lane.b32.xlu0 %v4832_v9, %s7930_s22  ;;  %s7934_s21 = smov 112  }
 0x55c   : > { %5976 = vmatprep.subr.bf16.mxu0 %v6311_v4 }
 0x56d   : > { %v4288_v49 = vpop.f32.mrf.mxu1 }
 0x56e   : > { %v4478_v46 = vcombine.low %v4196_v28, %v4288_v49  ;;  %v4479_v2 = vcombine.high %v4196_v28, %v4288_v49  ;;  %v4242_v25 = vpop.f32.mrf.mxu0 }
 0x56f   : > { %v5934_v13 = vpop.f32.mrf.mxu1  ;;  %v4462_v29 = vcombine.low %v7709_v12, %v4242_v25  ;;  %v4463_v0 = vcombine.high %v7709_v12, %v4242_v25 }
 0x570   : > { %v5928_v14 = vpop.f32.mrf.mxu0  ;;  %v4486_v40 = vrot.slane %v4478_v46, %v6651_v57  ;;  %v4493_v37 = vrot.slane %v4479_v2, %v6651_v57 }
 0x571   : > { %v4291_v17 = vpop.f32.mrf.mxu1  ;;  %v4470_v24 = vrot.slane %v4462_v29, %v6651_v57  ;;  %v4477_v32 = vrot.slane %v4463_v0, %v6651_v57 }
 0x572   : > { %v4245_v38 = vpop.f32.mrf.mxu0 }
 0x573   : > { %v5935_v45 = vpop.f32.mrf.mxu1  ;;  %v4526_v15 = vcombine.low %v4470_v24, %v4486_v40  ;;  %v4527_v34 = vcombine.high %v4470_v24, %v4486_v40  ;;  %v4542_v10 = vcombine.low %v4477_v32, %v4493_v37  ;;  %v4543_v8 = vcombine.high %v4477_v32, %v4493_v37 }
 0x574   : > { %v5929_v33 = vpop.f32.mrf.mxu0 }
 0x575   : > { %v4534_v12 = vrot.slane %v4526_v15, %v6656_v63  ;;  %v4541_v7 = vrot.slane %v4527_v34, %v6656_v63  ;;  %v4550_v30 = vrot.slane %v4542_v10, %v6656_v63  ;;  %v4557_v60 = vrot.slane %v4543_v8, %v6656_v63  ;;  %v6128_v10 = vld [vmem:[%s6496_s18 + $0x38] sm:$0xff]   ;;  %v6129_v8 = vld [vmem:[%s6496_s18 + $0x30] sm:$0xff]  }
 0x576   : > { %5957 = vmatpush3.bf16.msra.mxu1 %v6128_v10 }
 0x577   : > { %v5584_v28 = vcombine.low %v4534_v12, %v4541_v7  ;;  %v5586_v55 = vcombine.high %v4534_v12, %v4541_v7  ;;  %v5588_v23 = vcombine.low %v4550_v30, %v4557_v60  ;;  %v5590_v54 = vcombine.high %v4550_v30, %v4557_v60  ;;  %5958 = vmatprep.subr.bf16.mxu1 %v6311_v4 }
 0x579   : > { %v4717_v22 = vrot.slane %v5584_v28, %v6651_v57  ;;  %v4733_v27 = vrot.slane %v5586_v55, %v6651_v57  ;;  %v4749_v19 = vrot.slane %v5588_v23, %v6651_v57  ;;  %v4765_v35 = vrot.slane %v5590_v54, %v6651_v57  ;;  %v6130_v55 = vld [vmem:[%s6496_s18 + $0x28] sm:$0xff]   ;;  %v6131_v23 = vld [vmem:[%s6496_s18 + $0x20] sm:$0xff]   ;;  %v6132_v54 = vld [vmem:[%s6496_s18 + $0x18] sm:$0xff]  }
 0x57a   : > { %5959 = vmatpush3.bf16.msra.mxu1 %v6129_v8 }
 0x57b   : > { %v4782_v44 = vcombine.low %v4717_v22, %v4733_v27  ;;  %v4814_v43 = vcombine.low %v4749_v19, %v4765_v35  ;;  %v4783_v62 = vcombine.high %v4717_v22, %v4733_v27  ;;  %v4815_v3 = vcombine.high %v4749_v19, %v4765_v35  ;;  %5960 = vmatprep.subr.bf16.mxu1 %v6311_v4  ;;  %v6133_v22 = vld [vmem:[%s6496_s18 + $0x10] sm:$0xff]   ;;  %v6134_v27 = vld [vmem:[%s6496_s18 + $0x8] sm:$0xff]   ;;  %v6135_v19 = vld [vmem:[%s6496_s18] sm:$0xff]  }
 0x57c   : > { %v6136_v35 = vld [vmem:[%s6501_s13 + $0x38] sm:$0xff]  }
 0x57d   : > { %v4790_v52 = vrot.slane %v4782_v44, %v6656_v63  ;;  %v4822_v20 = vrot.slane %v4814_v43, %v6656_v63  ;;  %v4797_v50 = vrot.slane %v4783_v62, %v6656_v63  ;;  %v4829_v16 = vrot.slane %v4815_v3, %v6656_v63  ;;  %v6138_v44 = vld [vmem:[%s6501_s13 + $0x28] sm:$0xff]   ;;  %v6139_v43 = vld [vmem:[%s6501_s13 + $0x20] sm:$0xff]   ;;  %v6140_v62 = vld [vmem:[%s6501_s13 + $0x18] sm:$0xff]  }
 0x57e   : > { %5961 = vmatpush3.bf16.msra.mxu1 %v6130_v55  ;;  %v6141_v3 = vld [vmem:[%s6501_s13 + $0x10] sm:$0xff]  }
 0x57f   : > { %v4835_v31 = vcombine.high %v4790_v52, %v4822_v20  ;;  %v4834_v18 = vcombine.low %v4790_v52, %v4822_v20  ;;  %v4837_v57 = vcombine.high %v4797_v50, %v4829_v16  ;;  %v4836_v56 = vcombine.low %v4797_v50, %v4829_v16  ;;  %5962 = vmatprep.subr.bf16.mxu1 %v6311_v4  ;;  %v6142_v52 = vld [vmem:[%s6501_s13 + $0x8] sm:$0xff]   ;;  %v5599_v16 = vld [vmem:[%s7935_s20] ss:$0 sm:$0xff] }
 0x581   : > { %4887 = vrot.lane.b32.xlu1 %v4835_v31, %s7931_s24  ;;  %4883 = vrot.lane.b32.xlu0 %v4834_v18, %s7932_s10 }
 0x582   : > { %5963 = vmatpush3.bf16.msra.mxu1 %v6131_v23 }
 0x583   : > { %5964 = vmatprep.subr.bf16.mxu1 %v6311_v4 }
 0x585   : > { %4895 = vrot.lane.b32.xlu1 %v4837_v57, %s7933_s30  ;;  %4891 = vrot.lane.b32.xlu0 %v4836_v56, %s7934_s21 }
 0x586   : > { %5965 = vmatpush3.bf16.msra.mxu1 %v6132_v54 }
 0x587   : > { %5966 = vmatprep.subr.bf16.mxu1 %v6311_v4 }
 0x58a   : > { %5967 = vmatpush3.bf16.msra.mxu1 %v6133_v22 }
 0x58b   : > { %5968 = vmatprep.subr.bf16.mxu1 %v6311_v4 }
 0x58e   : > { %5969 = vmatpush3.bf16.msra.mxu1 %v6134_v27 }
 0x58f   : > { %5970 = vmatprep.subr.bf16.mxu1 %v6311_v4 }
 0x592   : > { %5971 = vmatpush3.bf16.msra.mxu1 %v6135_v19 }
 0x5a4   : > { %v4844_v59 = vpop.permute.xlu1 %4843  ;;  %v4840_v5 = vpop.permute.xlu0 %4839 }
 0x5a5   : > { %v4898_v26 = vsel %vm2574_vm1, %v4694_v41, %v4840_v5  ;;  %vm4925_vm1 = vcmask 982016   ;;  %v6143_v5 = vld [vmem:[%s6501_s13] sm:$0xff]  }
 0x5a6   : > { %v4900_v51 = vsel %vm4899_vm3, %v4898_v26, %v4844_v59 }
 0x5a8   : > { %v4848_v48 = vpop.permute.xlu1 %4847 }
 0x5a9   : > { %v4902_v39 = vsel %vm4901_vm4, %v4900_v51, %v4848_v48 }
 0x5b9   : > { %v4852_v6 = vpop.permute.xlu0 %4851  ;;  %v4856_v63 = vpop.permute.xlu1 %4855 }
 0x5ba   : > { %v4904_v47 = vsel %vm4903_vm5, %v4902_v39, %v4852_v6 }
 0x5bb   : > { %v4906_v49 = vsel %vm4905_vm6, %v4904_v47, %v4856_v63 }
 0x5bd   : > { %v4864_v11 = vpop.permute.xlu1 %4863 }
 0x5be   : > { %v4860_v9 = vpop.permute.xlu0 %4859 }
 0x5bf   : > { %v4908_v2 = vsel %vm4907_vm7, %v4906_v49, %v4860_v9 }
 0x5c0   : > { %v4910_v42 = vsel %vm4909_vm8, %v4908_v2, %v4864_v11 }
 0x5c9   : > { %v4868_v46 = vpop.permute.xlu0 %4867  ;;  %v4872_v13 = vpop.permute.xlu1 %4871 }
 0x5ca   : > { %v4912_v1 = vsel %vm4911_vm9, %v4910_v42, %v4868_v46 }
 0x5cb   : > { %v4914_v29 = vsel %vm4913_vm10, %v4912_v1, %v4872_v13 }
 0x5cd   : > { %v4876_v41 = vpop.permute.xlu0 %4875  ;;  %v4880_v25 = vpop.permute.xlu1 %4879 }
 0x5ce   : > { %v4916_v0 = vsel %vm4915_vm11, %v4914_v29, %v4876_v41 }
 0x5cf   : > { %v4918_v14 = vsel %vm4917_vm12, %v4916_v0, %v4880_v25 }
 0x5f3   : > { %v4888_v17 = vpop.permute.xlu1 %4887  ;;  %v4884_v40 = vpop.permute.xlu0 %4883 }
 0x5f4   : > { %v4920_v37 = vsel %vm4919_vm13, %v4918_v14, %v4884_v40 }
 0x5f5   : > { %v4922_v32 = vsel %vm4921_vm14, %v4920_v37, %v4888_v17 }
 0x5f7   : > { %v4896_v24 = vpop.permute.xlu1 %4895  ;;  %v4892_v45 = vpop.permute.xlu0 %4891 }
 0x5f8   : > { %v4924_v38 = vsel %vm4923_vm15, %v4922_v32, %v4892_v45 }
 0x5f9   : > { %v4926_v15 = vsel %vm4925_vm1, %v4924_v38, %v4896_v24 }
 0x5fa   : > { %v4927_v34 = vpack.c.bf16 %v4926_v15, %v4926_v15 }
 0x5fc   : > { %5953 = vmatmul.mubr.bf16.vlgmr.msra.gmra.mxu0 %v4927_v34 }
 0x5fd   : > { %5992 = vmatprep.mubr.msk.bf16.mxu0 %vm6313_vm0, %v6311_v4  ;;  %5977 = vmatpush3.bf16.msra.mxu0 %v6136_v35 }
 0x5fe   : > { %5978 = vmatprep.subr.bf16.mxu0 %v6311_v4 }
 0x601   : > { %5979 = vmatpush3.bf16.msra.mxu0 %v6137_v36 }
 0x602   : > { %5980 = vmatprep.subr.bf16.mxu0 %v6311_v4 }
 0x605   : > { %5981 = vmatpush3.bf16.msra.mxu0 %v6138_v44 }
 0x606   : > { %5982 = vmatprep.subr.bf16.mxu0 %v6311_v4 }
 0x609   : > { %5983 = vmatpush3.bf16.msra.mxu0 %v6139_v43 }
 0x60a   : > { %5984 = vmatprep.subr.bf16.mxu0 %v6311_v4 }
 0x60d   : > { %5985 = vmatpush3.bf16.msra.mxu0 %v6140_v62 }
 0x60e   : > { %5986 = vmatprep.subr.bf16.mxu0 %v6311_v4 }
 0x611   : > { %5987 = vmatpush3.bf16.msra.mxu0 %v6141_v3 }
 0x612   : > { %5988 = vmatprep.subr.bf16.mxu0 %v6311_v4 }
 0x615   : > { %5989 = vmatpush3.bf16.msra.mxu0 %v6142_v52 }
 0x616   : > { %5990 = vmatprep.subr.bf16.mxu0 %v6311_v4 }
 0x619   : > { %5991 = vmatpush3.bf16.msra.mxu0 %v6143_v5 }
 0x6bc   : > { %v5026_v33 = vpop.f32.mrf.mxu0 }
 0x6bd   : > { %v7787_v12 = vadd.f32 %v6212_v58, %v5026_v33 }
 0x6be   : > { %v5954_v7 = vpop.f32.mrf.mxu0 }
 0x6bf   : > { %v5034_v30 = vmul.f32 %v7787_v12, %v7787_v12 }
 0x6c0   : > { %v5029_v60 = vpop.f32.mrf.mxu0 }
 0x6c1   : > { %5035 = vadd.xlane.f32.xlu0 %v5034_v30 }
 0x6c2   : > { %v5955_v28 = vpop.f32.mrf.mxu0 }
 0x74a   : > { %v5036_v20 = vpop.xlane.xlu0 %5035 }
 0x74b   : > { %v5037_v31 = vmul.f32 0.03125, %v5036_v20 }
 0x74d   : > { %v5038_v18 = vadd.f32 1e-06, %v5037_v31 }
 0x74f   : > { %6210 = vrsqrt.f32 %v5038_v18 }
 0x75c   : > { %v6211_v50 = vpop.eup %6210 }
 0x75d   : > { %v5040_v57 = vmul.f32 %v6211_v50, %v7787_v12 }
 0x75f   : > { %v5047_v56 = vmul.f32 %v5599_v16, %v5040_v57 }
 0x761   : > { %v5048_v59 = vpack.c.bf16 %v5047_v56, %v5047_v56 }
 0x763   : > { %5973 = vmatmul.mubr.bf16.vlgmr.msra.gmra.mxu1 %v5048_v59 }
 0x823   : > { %v5147_v48 = vpop.f32.mrf.mxu1 }
 0x824   : > { %v5153_v6 = vmax.f32 %v5147_v48, 0.0 }
 0x825   : > { %v5974_v4 = vpop.f32.mrf.mxu1 }
 0x826   : > { %v5154_v26 = vpack.c.bf16 %v5153_v6, %v5153_v6 }
 0x827   : > { %v5150_v63 = vpop.f32.mrf.mxu1 }
 0x828   : > { %5993 = vmatmul.mubr.bf16.vlgmr.msra.gmra.mxu0 %v5154_v26 }
 0x829   : > { %v5975_v51 = vpop.f32.mrf.mxu1 }
 0x8e8   : > { %v5253_v39 = vpop.f32.mrf.mxu0 }
 0x8e9   : > { %v5259_v9 = vadd.f32 %v5253_v39, %v7787_v12 }
 0x8ea   : > { %v5994_v47 = vpop.f32.mrf.mxu0  ;;  %5264 = sbr.rel (%p5616_p1) target bundleno = 2466 (0x9a2), region = 68 }
 0x8eb   : > { %5260 = vst [vmem:[#allocation2] sm:$0xff] %v5259_v9 }
 0x8ec   : > { %v5256_v11 = vpop.f32.mrf.mxu0 }
 0x8ee   : > { %v5995_v49 = vpop.f32.mrf.mxu0 }
 0x8ef   : > { %v5266_v46 = vmul.f32 %v5259_v9, %v5259_v9  ;;  %vm5294_vm0 = vcmask 57344   ;;  %v5283_v2 = vrot.slane %v7302_v61, %v3346_v21  ;;  %v5617_v17 = vld [vmem:[%s7889_s9] ss:$0 sm:$0xff] }
 0x8f0   : > { %v5295_v13 = vsel %vm5294_vm0, %v7302_v61, 0.0 }
 0x8f1   : > { %5267 = vadd.xlane.f32.xlu0 %v5266_v46  ;;  %5285 = vbcast.lane.b32.xlu1 %v5283_v2, 256 }
 0x8f5   : > { %5296 = vadd.xlane.f32.xlu0 %v5295_v13 }
 0x963   : > { %v5286_v14 = vpop.permute.xlu1 %5285 }
 0x97a   : > { %v5268_v42 = vpop.xlane.xlu0 %5267 }
 0x97b   : > { %v5269_v1 = vmul.f32 0.03125, %v5268_v42 }
 0x97d   : > { %v5270_v41 = vadd.f32 1e-06, %v5269_v1 }
 0x97e   : > { %v5297_v25 = vpop.xlane.xlu0 %5296 }
 0x97f   : > { %6213 = vrsqrt.f32 %v5270_v41  ;;  %v5298_v29 = vmax.f32 %v5297_v25, 1.0 }
 0x981   : > { %6215 = vrcp.f32 %v5298_v29 }
 0x98c   : > { %v6214_v0 = vpop.eup %6213 }
 0x98d   : > { %v5272_v53 = vmul.f32 %v6214_v0, %v5259_v9 }
 0x98e   : > { %v6216_v38 = vpop.eup %6215 }
 0x98f   : > { %v5279_v21 = vmul.f32 %v5617_v17, %v5272_v53 }
 0x991   : > { %v5287_v40 = vmul.f32 %v5286_v14, %v5279_v21 }
 0x993   : > { %v5288_v37 = vrot.slane %v5287_v40, 4 }
 0x995   : > { %v5289_v61 = vadd.f32 %v5288_v37, %v5287_v40 }
 0x997   : > { %v5290_v24 = vrot.slane %v5289_v61, 2 }
 0x999   : > { %v5291_v32 = vadd.f32 %v5290_v24, %v5289_v61 }
 0x99b   : > { %v5292_v45 = vrot.slane %v5291_v32, 1 }
 0x99d   : > { %v5293_v15 = vadd.f32 %v5292_v45, %v5291_v32 }
 0x99f   : > { %v5300_v34 = vmul.f32 %v6216_v38, %v5293_v15 }
 0x9a1   : > { %5301 = vst [vmem:[%s6505_s0] sm:$0x1] %v5300_v34 }
 0x9a2 PF: > { %s7936_s13 = sld [smem:[#allocation8_spill]]  ;;  %s5315_s28 = sshll.u32 %s6505_s0, 4  ;;  %s5316_s28 = int_to_ptr.vmem [resolvable:$true] %s5315_s28 }
 0x9a3   : > { %s7938_s26 = sld [smem:[#allocation18_spill]]  ;;  %s7939_s27 = sand.u32 1, %s6285_s14  }
 0x9a4   : > { %s5303_s11 = scalar_lea.sflag [#allocation4], %s7939_s27  ;;  %s6217_s22 = scalar_lea.vmem %s5316_s28, 16 }
 0x9a5   : > { %p6218_p2 = scmp.ne.s32.totalorder %s5316_s28, %s6217_s22  ;;  %s6331_s24 = smov [#allocation3]  }
 0x9a6   : > { %s6221_s10 = sshll.u32 %s6331_s24, 4  ;;  %s6222_s10 = int_to_ptr.vmem [resolvable:$false] %s6221_s10 }
 0x9a7   : > { %p6219_p4 = pnand %p6218_p2, %p6436_p3  ;;  %s6223_s30 = scalar_lea.vmem %s6222_s10, 32 }
 0x9a8   : > { %s5618_s17 = sshll.u32 %s7936_s13, 4  ;;  %p6224_p6 = scmp.lt.s32.totalorder %s5316_s28, %s6222_s10 }
 0x9a9   : > { %s5313_s29 = scalar_lea.hbm %s7938_s26, %s5618_s17  ;;  %p6220_p5 = pneg %p6219_p4 }
 0x9aa   : > { %p6225_p7 = scmp.lt.s32.totalorder %s6223_s30, %s6217_s22 }
 0x9ac   : > { %p6226_p8 = por %p6225_p7, %p6224_p6 }
 0x9ae   : > { %p6227_p10 = pnand %p6226_p8, %p6220_p5 }
 0x9b0   : > { %6230 = shalt.err (!%p6227_p10)
}
 0x9b1   : > { %s6231_s21 = scalar_lea.hbm %s5313_s29, 16  ;;  %s6235_s19 = scalar_lea.hbm %s7938_s26, 32 }
 0x9b2   : > { %p6232_p11 = scmp.ne.s32.totalorder %s5313_s29, %s6231_s21  ;;  %p6236_p0 = scmp.lt.s32.totalorder %s5313_s29, %s7938_s26 }
 0x9b3   : > { %p6237_p1 = scmp.lt.s32.totalorder %s6235_s19, %s6231_s21 }
 0x9b4   : > { %p6233_p12 = pnand %p6232_p11, %p6436_p3 }
 0x9b5   : > { %p6238_p2 = por %p6237_p1, %p6236_p0 }
 0x9b6   : > { %p6234_p13 = pneg %p6233_p12 }
 0x9b8   : > { %p6239_p4 = pnand %p6238_p2, %p6234_p13 }
 0x9ba   : > { %6242 = shalt.err (!%p6239_p4)
}
 0x9bb   : > { %5997 = dma.vmem_to_hbm [thread:$0]  (%p6436_p3), %s5316_s28, 16, %s5313_s29, %s5303_s11  }
 0x9bc PF: > { %s7940_s12 = sld [smem:[#allocation11_spill]] }
 0x9bd   : > { %s7941_s13 = sld [smem:[#allocation6_spill]] }
 0x9c2   : > { %p6003_p5 = scmp.ge.s32.totalorder %s7940_s12, 2 }
 0x9c3   : > { %s5327_s23 = sand.u32 1, %s7941_s13  }
 0x9c4   : > { %p6000_p6 = pnand %p6003_p5, %p6446_p9  ;;  %s5328_s25 = scalar_lea.sflag [#allocation4], %s5327_s23 }
 0x9c6   : > { %p6001_p7 = pneg %p6000_p6 }
 0x9c8   : > { %6276 = dma.done.wait (%p6001_p7), %s5328_s25, 16  }
 0x9c9   : > { %6278 = vsyncadd (%p6001_p7), %s5328_s25, 4294967280  ;;  %s23_s20 = sadd.s32 1, %s7940_s12   ;;  %s7943_s27 = sld [smem:[#allocation7_spill]] }
 0x9ca   : > { %p20_p8 = scmp.ge.s32.totalorder %s23_s20, 6   ;;  %s7944_s15 = sld [smem:[#allocation16_spill]] }
 0x9cb   : > { %s7945_s16 = sld [smem:[#allocation9_spill]]  ;;  %s7949_s13 = smov %s6285_s14 }
 0x9cc   : > { %s7946_s17 = sld [smem:[#allocation10_spill]]  ;;  %22 = sbr.rel (!%p20_p8) target bundleno = 8 (0x8), region = 124 }
 0x9cd   : > { %s7947_s18 = sld [smem:[#allocation12_spill]] }
 0x9ce   : > { %s7948_s19 = sld [smem:[#allocation14_spill]] }
 0x9cf   : > { %s7950_s14 = smov %s7943_s27 }
 0x9d1   :  { %5332 = vsyncpa [#allocation4], 1 }
 0x9d2   :  { %5334 = vsyncpa [#allocation4 + $0x1], 1 }

</bundles_post_ra>
